<compile_context>
chip_gen: v6e
topology: v6e:2x2x1
jax: 0.10.0
libtpu: 0.0.40
codegen_flags: <defaults>
</compile_context>

<pallas_src>
import functools

import jax
import jax.numpy as jnp
from jax.experimental import pallas as pl
from jax.experimental.pallas import tpu as pltpu


def _shift2d(a, dy, dx):
    """b[y, x] = a[y + dy, x + dx], zero-filled outside the tile. a: (R, W, C)."""
    r, w, c = a.shape
    if dy == 1:
        a = jnp.concatenate([a[1:], jnp.zeros((1, w, c), a.dtype)], axis=0)
    elif dy == -1:
        a = jnp.concatenate([jnp.zeros((1, w, c), a.dtype), a[:-1]], axis=0)
    if dx == 1:
        a = jnp.concatenate([a[:, 1:], jnp.zeros((r, 1, c), a.dtype)], axis=1)
    elif dx == -1:
        a = jnp.concatenate([jnp.zeros((r, 1, c), a.dtype), a[:, :-1]], axis=1)
    return a


def _conv3x3_bn_relu(act, w_ref, s_ref, b_ref):
    """3x3 'SAME' conv (within the tile) + folded BN + ReLU.

    act: (R, Wp, C) bf16.  The 9 taps are fused into a single MXU matmul
    (im2col along K = 9*C) so the MXU sees one big contraction instead of 9
    tiny ones.  Returns (R, Wp, Cout) f32.
    """
    r, wp, c = act.shape
    taps = [_shift2d(act, dy, dx) for dy in (-1, 0, 1) for dx in (-1, 0, 1)]
    patches = jnp.concatenate(taps, axis=-1).reshape(r * wp, 9 * c)
    acc = jnp.dot(patches, w_ref[...], preferred_element_type=jnp.float32)
    out = jnp.maximum(acc * s_ref[...] + b_ref[...], 0.0)
    return out.reshape(r, wp, -1)


def _down_kernel(xt_ref, xm_ref, xb_ref, w1_ref, s1_ref, b1_ref,
                 w2_ref, s2_ref, b2_ref, o_ref, *, hp):
    # xm_ref block: (1, T, Wp, 4*Cin) bf16 -- the 2x2 pool window is packed
    # into the last (lane) dim.  xt_ref / xb_ref are the 2-pooled-row halos
    # above / below (clamped at the image boundary; masked below).
    _, t, wp, c4 = xm_ref.shape
    cin = c4 // 4
    cout = w2_ref.shape[1]
    r0 = pl.program_id(1) * t          # first pooled output row of this tile

    # Stitch halo + main block: (T+4, Wp, 4*Cin).
    xin = jnp.concatenate([xt_ref[...][0], xm_ref[...][0], xb_ref[...][0]],
                          axis=0)

    # ---- MaxPool2d(2): max over the four lane-packed sub-pixels ----------
    pooled = jnp.maximum(
        jnp.maximum(xin[:, :, 0 * cin:1 * cin], xin[:, :, 1 * cin:2 * cin]),
        jnp.maximum(xin[:, :, 2 * cin:3 * cin], xin[:, :, 3 * cin:4 * cin]))

    # Zero halo rows that fall outside the image (SAME zero padding).
    g4 = jax.lax.broadcasted_iota(jnp.int32, (t + 4, 1, 1), 0) + (r0 - 2)
    pooled = jnp.where((g4 >= 0) & (g4 < hp), pooled, 0)

    # ---- conv1 + BN1 + ReLU; keep the T+2 rows that only used in-tile data.
    h = _conv3x3_bn_relu(pooled, w1_ref, s1_ref, b1_ref)[1:t + 3]
    g2 = jax.lax.broadcasted_iota(jnp.int32, (t + 2, 1, 1), 0) + (r0 - 1)
    h = jnp.where((g2 >= 0) & (g2 < hp), h, 0.0)     # conv2's SAME padding

    # ---- conv2 + BN2 + ReLU; keep the T valid output rows ----------------
    y = _conv3x3_bn_relu(h.astype(xin.dtype), w2_ref, s2_ref, b2_ref)[1:t + 1]

    o_ref[...] = y.reshape(1, t * wp, cout).astype(o_ref.dtype)


def _choose_tile_rows(hp, wp):
    """Pick a pooled-row tile: even divisor of Hp, ~128-512 matmul rows."""
    target = max(2, 256 // max(wp, 1))
    if target >= hp:
        return hp
    for t in range(2, hp + 1, 2):
        if hp % t == 0 and (t * wp) % 8 == 0 and t >= target:
            return t
    return hp


@functools.partial(jax.jit, static_argnames=("tile_rows",))
def down_forward(x_nchw, w1_oihw, s1, b1, w2_oihw, s2, b2, *, tile_rows=None):
    """x_nchw: (N, Cin, H, W) f32.  Returns (N, Cout, H//2, W//2) f32."""
    n, cin, h, w = x_nchw.shape
    assert h % 2 == 0 and w % 2 == 0, "MaxPool2d(2) needs even H and W"
    hp, wp = h // 2, w // 2
    assert hp >= 2
    cmid = w1_oihw.shape[0]
    cout = w2_oihw.shape[0]

    t = tile_rows if tile_rows is not None else _choose_tile_rows(hp, wp)
    assert hp % t == 0, "tile_rows must divide H//2"
    assert t % 2 == 0 or t == hp, "tile_rows must be even (or the full image)"
    assert (t * wp) % 8 == 0 or t == hp
    n_tiles = hp // t

    # Pack each 2x2 pool window into the lane dim and cast to bf16:
    # (N,C,H,W) -> (N, Hp, Wp, 2*2*C).  One fused XLA transpose.
    # TODO(synk): keep activations in this packed NHWC layout end-to-end in
    # the surrounding model to drop this transpose and the output one below.
    x = x_nchw.astype(jnp.bfloat16).reshape(n, cin, hp, 2, wp, 2)
    x = jnp.transpose(x, (0, 2, 4, 3, 5, 1)).reshape(n, hp, wp, 4 * cin)

    # Conv weights: OIHW -> (kh*kw*Cin, Cout) bf16 (one matmul per conv).
    w1 = jnp.transpose(w1_oihw, (2, 3, 1, 0)).reshape(9 * cin, cmid)
    w1 = w1.astype(jnp.bfloat16)
    w2 = jnp.transpose(w2_oihw, (2, 3, 1, 0)).reshape(9 * cmid, cout)
    w2 = w2.astype(jnp.bfloat16)
    s1_2d, b1_2d = s1.reshape(1, cmid), b1.reshape(1, cmid)
    s2_2d, b2_2d = s2.reshape(1, cout), b2.reshape(1, cout)

    # Halo index maps (block size 2 along the pooled-row dim), clamped at the
    # image boundary; clamped rows are masked to zero inside the kernel.
    half = t // 2
    bot_cap = max((hp - 2) // 2, 0)

    def top_map(i, r):
        return (i, jnp.maximum(r * half - 1, 0), 0, 0)

    def bot_map(i, r):
        return (i, jnp.minimum((r + 1) * half, bot_cap), 0, 0)

    kernel = functools.partial(_down_kernel, hp=hp)

    # TODO(synk): single-buffer the grid-invariant weight/scale/shift specs
    # (pl.Buffered(1)) and pad Cout / pack W into lanes when channels are tiny.
    out_flat = pl.pallas_call(
        kernel,
        out_shape=jax.ShapeDtypeStruct((n, hp * wp, cout), jnp.float32),
        grid=(n, n_tiles),
        in_specs=[
            pl.BlockSpec((1, 2, wp, 4 * cin), top_map),
            pl.BlockSpec((1, t, wp, 4 * cin), lambda i, r: (i, r, 0, 0)),
            pl.BlockSpec((1, 2, wp, 4 * cin), bot_map),
            pl.BlockSpec((9 * cin, cmid), lambda i, r: (0, 0)),
            pl.BlockSpec((1, cmid), lambda i, r: (0, 0)),
            pl.BlockSpec((1, cmid), lambda i, r: (0, 0)),
            pl.BlockSpec((9 * cmid, cout), lambda i, r: (0, 0)),
            pl.BlockSpec((1, cout), lambda i, r: (0, 0)),
            pl.BlockSpec((1, cout), lambda i, r: (0, 0)),
        ],
        out_specs=pl.BlockSpec((1, t * wp, cout), lambda i, r: (i, r, 0)),
        compiler_params=pltpu.CompilerParams(
            dimension_semantics=("parallel", "parallel"),
            vmem_limit_bytes=40 * 1024 * 1024),
    )(x, x, x, w1, s1_2d, b1_2d, w2, s2_2d, b2_2d)

    out = out_flat.reshape(n, hp, wp, cout)
    return jnp.transpose(out, (0, 3, 1, 2))                 # back to NCHW


def _fold_bn(gamma, beta, mean, var, eps=1e-5):
    scale = gamma / jnp.sqrt(var + eps)
    return scale, beta - mean * scale


def _ref_forward(x_nchw, w1_oihw, s1, b1, w2_oihw, s2, b2):
    """Plain-JAX reference (bf16 matmul inputs, f32 accumulation, like kernel)."""
    p = jax.lax.reduce_window(x_nchw, -jnp.inf, jax.lax.max,
                              (1, 1, 2, 2), (1, 1, 2, 2), "VALID")

    def conv(x_, w_):
        return jax.lax.conv_general_dilated(
            x_.astype(jnp.bfloat16), w_.astype(jnp.bfloat16), (1, 1), "SAME",
            dimension_numbers=("NCHW", "OIHW", "NCHW"),
            preferred_element_type=jnp.float32)

    h = conv(p, w1_oihw)
    h = jnp.maximum(h * s1[None, :, None, None] + b1[None, :, None, None], 0.0)
    y = conv(h, w2_oihw)
    y = jnp.maximum(y * s2[None, :, None, None] + b2[None, :, None, None], 0.0)
    return y


if __name__ == "__main__":
    N, Cin, Cout, H, W = 2, 4, 8, 16, 16
    Cmid = Cout  # UNetConvBlock: mid_channels defaults to out_channels

    key = jax.random.PRNGKey(0)
    ks = jax.random.split(key, 12)

    x = jax.random.normal(ks[0], (N, Cin, H, W), jnp.float32)

    # Conv weights in PyTorch OIHW layout (no bias).
    w1_oihw = 0.1 * jax.random.normal(ks[1], (Cmid, Cin, 3, 3), jnp.float32)
    w2_oihw = 0.1 * jax.random.normal(ks[2], (Cout, Cmid, 3, 3), jnp.float32)

    # BatchNorm params / running stats, folded into scale & shift.
    g1 = 1.0 + 0.1 * jax.random.normal(ks[3], (Cmid,), jnp.float32)
    be1 = 0.1 * jax.random.normal(ks[4], (Cmid,), jnp.float32)
    m1 = 0.1 * jax.random.normal(ks[5], (Cmid,), jnp.float32)
    v1 = jax.random.uniform(ks[6], (Cmid,), jnp.float32, 0.5, 1.5)
    g2 = 1.0 + 0.1 * jax.random.normal(ks[7], (Cout,), jnp.float32)
    be2 = 0.1 * jax.random.normal(ks[8], (Cout,), jnp.float32)
    m2 = 0.1 * jax.random.normal(ks[9], (Cout,), jnp.float32)
    v2 = jax.random.uniform(ks[10], (Cout,), jnp.float32, 0.5, 1.5)

    s1, b1 = _fold_bn(g1, be1, m1, v1)
    s2, b2 = _fold_bn(g2, be2, m2, v2)

    # tile_rows=4 -> 2 row tiles per image, exercising the halo path.
    out = down_forward(x, w1_oihw, s1, b1, w2_oihw, s2, b2, tile_rows=4)
    out = jax.block_until_ready(out)

    ref = _ref_forward(x, w1_oihw, s1, b1, w2_oihw, s2, b2)
    assert out.shape == (N, Cout, H // 2, W // 2)
    max_err = float(jnp.max(jnp.abs(out - ref)))
    assert jnp.allclose(out, ref, rtol=1e-2, atol=1e-2), max_err

    print("KERNEL_OK")
</pallas_src>

<mosaic_0001>
module attributes {stable_mosaic.version = 11 : i64} {
  func.func @_down_kernel(%arg0: i32, %arg1: i32, %arg2: memref<1x2x8x16xbf16, #tpu.memory_space<vmem>>, %arg3: memref<1x4x8x16xbf16, #tpu.memory_space<vmem>>, %arg4: memref<1x2x8x16xbf16, #tpu.memory_space<vmem>>, %arg5: memref<36x8xbf16, #tpu.memory_space<vmem>>, %arg6: memref<1x8xf32, #tpu.memory_space<vmem>>, %arg7: memref<1x8xf32, #tpu.memory_space<vmem>>, %arg8: memref<72x8xbf16, #tpu.memory_space<vmem>>, %arg9: memref<1x8xf32, #tpu.memory_space<vmem>>, %arg10: memref<1x8xf32, #tpu.memory_space<vmem>>, %arg11: memref<1x32x8xf32, #tpu.memory_space<vmem>>) attributes {dimension_semantics = [#tpu.dimension_semantics<parallel>, #tpu.dimension_semantics<parallel>], iteration_bounds = array<i64: 2, 2>, scalar_prefetch = 0 : i64, scratch_operands = 0 : i64, tpu.core_type = #tpu.core_type<tc>, window_params = [{transform_indices = @transform_0, window_bounds = array<i64: 1, 2, 8, 16>}, {transform_indices = @transform_1, window_bounds = array<i64: 1, 4, 8, 16>}, {transform_indices = @transform_2, window_bounds = array<i64: 1, 2, 8, 16>}, {pipeline_mode = #tpu.pipeline_mode<synchronous>, transform_indices = @transform_3, window_bounds = array<i64: 36, 8>}, {pipeline_mode = #tpu.pipeline_mode<synchronous>, transform_indices = @transform_4, window_bounds = array<i64: 1, 8>}, {pipeline_mode = #tpu.pipeline_mode<synchronous>, transform_indices = @transform_5, window_bounds = array<i64: 1, 8>}, {pipeline_mode = #tpu.pipeline_mode<synchronous>, transform_indices = @transform_6, window_bounds = array<i64: 72, 8>}, {pipeline_mode = #tpu.pipeline_mode<synchronous>, transform_indices = @transform_7, window_bounds = array<i64: 1, 8>}, {pipeline_mode = #tpu.pipeline_mode<synchronous>, transform_indices = @transform_8, window_bounds = array<i64: 1, 8>}, {transform_indices = @transform_9, window_bounds = array<i64: 1, 32, 8>}]} {
    %c4_i32 = arith.constant 4 : i32
    %0 = arith.muli %arg1, %c4_i32 : i32
    %c0 = arith.constant 0 : index
    %c0_0 = arith.constant 0 : index
    %c0_1 = arith.constant 0 : index
    %c0_2 = arith.constant 0 : index
    %1 = vector.load %arg2[%c0, %c0_0, %c0_1, %c0_2] : memref<1x2x8x16xbf16, #tpu.memory_space<vmem>>, vector<1x2x8x16xbf16>
    %2 = vector.shape_cast %1 : vector<1x2x8x16xbf16> to vector<2x8x16xbf16>
    %c0_3 = arith.constant 0 : index
    %c0_4 = arith.constant 0 : index
    %c0_5 = arith.constant 0 : index
    %c0_6 = arith.constant 0 : index
    %3 = vector.load %arg3[%c0_3, %c0_4, %c0_5, %c0_6] : memref<1x4x8x16xbf16, #tpu.memory_space<vmem>>, vector<1x4x8x16xbf16>
    %4 = vector.shape_cast %3 : vector<1x4x8x16xbf16> to vector<4x8x16xbf16>
    %c0_7 = arith.constant 0 : index
    %c0_8 = arith.constant 0 : index
    %c0_9 = arith.constant 0 : index
    %c0_10 = arith.constant 0 : index
    %5 = vector.load %arg4[%c0_7, %c0_8, %c0_9, %c0_10] : memref<1x2x8x16xbf16, #tpu.memory_space<vmem>>, vector<1x2x8x16xbf16>
    %6 = vector.shape_cast %5 : vector<1x2x8x16xbf16> to vector<2x8x16xbf16>
    %7 = tpu.concatenate %2, %4, %6 in 0 : vector<2x8x16xbf16>, vector<4x8x16xbf16>, vector<2x8x16xbf16> -> vector<8x8x16xbf16>
    %8 = vector.extract_strided_slice %7 {offsets = [0, 0, 0], sizes = [8, 8, 4], strides = [1, 1, 1]} : vector<8x8x16xbf16> to vector<8x8x4xbf16>
    %9 = vector.extract_strided_slice %7 {offsets = [0, 0, 4], sizes = [8, 8, 4], strides = [1, 1, 1]} : vector<8x8x16xbf16> to vector<8x8x4xbf16>
    %10 = arith.maximumf %8, %9 : vector<8x8x4xbf16>
    %11 = vector.extract_strided_slice %7 {offsets = [0, 0, 8], sizes = [8, 8, 4], strides = [1, 1, 1]} : vector<8x8x16xbf16> to vector<8x8x4xbf16>
    %12 = vector.extract_strided_slice %7 {offsets = [0, 0, 12], sizes = [8, 8, 4], strides = [1, 1, 1]} : vector<8x8x16xbf16> to vector<8x8x4xbf16>
    %13 = arith.maximumf %11, %12 : vector<8x8x4xbf16>
    %14 = arith.maximumf %10, %13 : vector<8x8x4xbf16>
    %15 = tpu.iota {dimensions = array<i32: 0>} : vector<8x1x1xi32>
    %c2_i32 = arith.constant 2 : i32
    %16 = arith.subi %0, %c2_i32 : i32
    %17 = vector.broadcast %16 : i32 to vector<8x1x1xi32>
    %18 = arith.addi %15, %17 : vector<8x1x1xi32>
    %c0_i32 = arith.constant 0 : i32
    %19 = vector.broadcast %c0_i32 : i32 to vector<8x1x1xi32>
    %20 = arith.cmpi sge, %18, %19 : vector<8x1x1xi32>
    %c8_i32 = arith.constant 8 : i32
    %21 = vector.broadcast %c8_i32 : i32 to vector<8x1x1xi32>
    %22 = arith.cmpi slt, %18, %21 : vector<8x1x1xi32>
    %23 = arith.andi %20, %22 : vector<8x1x1xi1>
    %c0_i32_11 = arith.constant 0 : i32
    %24 = arith.sitofp %c0_i32_11 : i32 to bf16
    %25 = vector.shape_cast %23 : vector<8x1x1xi1> to vector<8x1x1xi1>
    %26 = vector.broadcast %25 : vector<8x1x1xi1> to vector<8x8x4xi1>
    %27 = vector.broadcast %24 : bf16 to vector<8x8x4xbf16>
    %28 = arith.select %26, %14, %27 : vector<8x8x4xi1>, vector<8x8x4xbf16>
    %cst = arith.constant 0.000000e+00 : bf16
    %29 = vector.broadcast %cst : bf16 to vector<1x8x4xbf16>
    %30 = vector.extract_strided_slice %28 {offsets = [0, 0, 0], sizes = [7, 8, 4], strides = [1, 1, 1]} : vector<8x8x4xbf16> to vector<7x8x4xbf16>
    %31 = tpu.concatenate %29, %30 in 0 : vector<1x8x4xbf16>, vector<7x8x4xbf16> -> vector<8x8x4xbf16>
    %cst_12 = arith.constant 0.000000e+00 : bf16
    %32 = vector.broadcast %cst_12 : bf16 to vector<8x1x4xbf16>
    %33 = vector.extract_strided_slice %31 {offsets = [0, 0, 0], sizes = [8, 7, 4], strides = [1, 1, 1]} : vector<8x8x4xbf16> to vector<8x7x4xbf16>
    %34 = tpu.concatenate %32, %33 in 1 : vector<8x1x4xbf16>, vector<8x7x4xbf16> -> vector<8x8x4xbf16>
    %cst_13 = arith.constant 0.000000e+00 : bf16
    %35 = vector.broadcast %cst_13 : bf16 to vector<1x8x4xbf16>
    %36 = vector.extract_strided_slice %28 {offsets = [0, 0, 0], sizes = [7, 8, 4], strides = [1, 1, 1]} : vector<8x8x4xbf16> to vector<7x8x4xbf16>
    %37 = tpu.concatenate %35, %36 in 0 : vector<1x8x4xbf16>, vector<7x8x4xbf16> -> vector<8x8x4xbf16>
    %cst_14 = arith.constant 0.000000e+00 : bf16
    %38 = vector.broadcast %cst_14 : bf16 to vector<1x8x4xbf16>
    %39 = vector.extract_strided_slice %28 {offsets = [0, 0, 0], sizes = [7, 8, 4], strides = [1, 1, 1]} : vector<8x8x4xbf16> to vector<7x8x4xbf16>
    %40 = tpu.concatenate %38, %39 in 0 : vector<1x8x4xbf16>, vector<7x8x4xbf16> -> vector<8x8x4xbf16>
    %41 = vector.extract_strided_slice %40 {offsets = [0, 1, 0], sizes = [8, 7, 4], strides = [1, 1, 1]} : vector<8x8x4xbf16> to vector<8x7x4xbf16>
    %cst_15 = arith.constant 0.000000e+00 : bf16
    %42 = vector.broadcast %cst_15 : bf16 to vector<8x1x4xbf16>
    %43 = tpu.concatenate %41, %42 in 1 : vector<8x7x4xbf16>, vector<8x1x4xbf16> -> vector<8x8x4xbf16>
    %cst_16 = arith.constant 0.000000e+00 : bf16
    %44 = vector.broadcast %cst_16 : bf16 to vector<8x1x4xbf16>
    %45 = vector.extract_strided_slice %28 {offsets = [0, 0, 0], sizes = [8, 7, 4], strides = [1, 1, 1]} : vector<8x8x4xbf16> to vector<8x7x4xbf16>
    %46 = tpu.concatenate %44, %45 in 1 : vector<8x1x4xbf16>, vector<8x7x4xbf16> -> vector<8x8x4xbf16>
    %47 = vector.extract_strided_slice %28 {offsets = [0, 1, 0], sizes = [8, 7, 4], strides = [1, 1, 1]} : vector<8x8x4xbf16> to vector<8x7x4xbf16>
    %cst_17 = arith.constant 0.000000e+00 : bf16
    %48 = vector.broadcast %cst_17 : bf16 to vector<8x1x4xbf16>
    %49 = tpu.concatenate %47, %48 in 1 : vector<8x7x4xbf16>, vector<8x1x4xbf16> -> vector<8x8x4xbf16>
    %50 = vector.extract_strided_slice %28 {offsets = [1, 0, 0], sizes = [7, 8, 4], strides = [1, 1, 1]} : vector<8x8x4xbf16> to vector<7x8x4xbf16>
    %cst_18 = arith.constant 0.000000e+00 : bf16
    %51 = vector.broadcast %cst_18 : bf16 to vector<1x8x4xbf16>
    %52 = tpu.concatenate %50, %51 in 0 : vector<7x8x4xbf16>, vector<1x8x4xbf16> -> vector<8x8x4xbf16>
    %cst_19 = arith.constant 0.000000e+00 : bf16
    %53 = vector.broadcast %cst_19 : bf16 to vector<8x1x4xbf16>
    %54 = vector.extract_strided_slice %52 {offsets = [0, 0, 0], sizes = [8, 7, 4], strides = [1, 1, 1]} : vector<8x8x4xbf16> to vector<8x7x4xbf16>
    %55 = tpu.concatenate %53, %54 in 1 : vector<8x1x4xbf16>, vector<8x7x4xbf16> -> vector<8x8x4xbf16>
    %56 = vector.extract_strided_slice %28 {offsets = [1, 0, 0], sizes = [7, 8, 4], strides = [1, 1, 1]} : vector<8x8x4xbf16> to vector<7x8x4xbf16>
    %cst_20 = arith.constant 0.000000e+00 : bf16
    %57 = vector.broadcast %cst_20 : bf16 to vector<1x8x4xbf16>
    %58 = tpu.concatenate %56, %57 in 0 : vector<7x8x4xbf16>, vector<1x8x4xbf16> -> vector<8x8x4xbf16>
    %59 = vector.extract_strided_slice %28 {offsets = [1, 0, 0], sizes = [7, 8, 4], strides = [1, 1, 1]} : vector<8x8x4xbf16> to vector<7x8x4xbf16>
    %cst_21 = arith.constant 0.000000e+00 : bf16
    %60 = vector.broadcast %cst_21 : bf16 to vector<1x8x4xbf16>
    %61 = tpu.concatenate %59, %60 in 0 : vector<7x8x4xbf16>, vector<1x8x4xbf16> -> vector<8x8x4xbf16>
    %62 = vector.extract_strided_slice %61 {offsets = [0, 1, 0], sizes = [8, 7, 4], strides = [1, 1, 1]} : vector<8x8x4xbf16> to vector<8x7x4xbf16>
    %cst_22 = arith.constant 0.000000e+00 : bf16
    %63 = vector.broadcast %cst_22 : bf16 to vector<8x1x4xbf16>
    %64 = tpu.concatenate %62, %63 in 1 : vector<8x7x4xbf16>, vector<8x1x4xbf16> -> vector<8x8x4xbf16>
    %65 = tpu.concatenate %34, %37, %43, %46, %28, %49, %55, %58, %64 in 2 : vector<8x8x4xbf16>, vector<8x8x4xbf16>, vector<8x8x4xbf16>, vector<8x8x4xbf16>, vector<8x8x4xbf16>, vector<8x8x4xbf16>, vector<8x8x4xbf16>, vector<8x8x4xbf16>, vector<8x8x4xbf16> -> vector<8x8x36xbf16>
    %66 = vector.shape_cast %65 : vector<8x8x36xbf16> to vector<64x36xbf16>
    %c0_23 = arith.constant 0 : index
    %c0_24 = arith.constant 0 : index
    %67 = vector.load %arg5[%c0_23, %c0_24] : memref<36x8xbf16, #tpu.memory_space<vmem>>, vector<36x8xbf16>
    %cst_25 = arith.constant dense<0.000000e+00> : vector<64x8xf32>
    %68 = tpu.matmul %66, %67, %cst_25 {dimension_numbers = #tpu.dot_dimension_numbers<[1], [0], [0], [1], [0, 0, 1, 1], [], []>} : vector<64x36xbf16>, vector<36x8xbf16>, vector<64x8xf32> -> vector<64x8xf32>
    %c0_26 = arith.constant 0 : index
    %c0_27 = arith.constant 0 : index
    %69 = vector.load %arg6[%c0_26, %c0_27] : memref<1x8xf32, #tpu.memory_space<vmem>>, vector<1x8xf32>
    %70 = vector.broadcast %69 : vector<1x8xf32> to vector<64x8xf32>
    %71 = arith.mulf %68, %70 : vector<64x8xf32>
    %c0_28 = arith.constant 0 : index
    %c0_29 = arith.constant 0 : index
    %72 = vector.load %arg7[%c0_28, %c0_29] : memref<1x8xf32, #tpu.memory_space<vmem>>, vector<1x8xf32>
    %73 = vector.broadcast %72 : vector<1x8xf32> to vector<64x8xf32>
    %74 = arith.addf %71, %73 : vector<64x8xf32>
    %cst_30 = arith.constant 0.000000e+00 : f32
    %75 = vector.broadcast %cst_30 : f32 to vector<64x8xf32>
    %76 = arith.maximumf %74, %75 : vector<64x8xf32>
    %77 = vector.shape_cast %76 : vector<64x8xf32> to vector<8x8x8xf32>
    %78 = vector.extract_strided_slice %77 {offsets = [1, 0, 0], sizes = [6, 8, 8], strides = [1, 1, 1]} : vector<8x8x8xf32> to vector<6x8x8xf32>
    %79 = tpu.iota {dimensions = array<i32: 0>} : vector<6x1x1xi32>
    %c1_i32 = arith.constant 1 : i32
    %80 = arith.subi %0, %c1_i32 : i32
    %81 = vector.broadcast %80 : i32 to vector<6x1x1xi32>
    %82 = arith.addi %79, %81 : vector<6x1x1xi32>
    %c0_i32_31 = arith.constant 0 : i32
    %83 = vector.broadcast %c0_i32_31 : i32 to vector<6x1x1xi32>
    %84 = arith.cmpi sge, %82, %83 : vector<6x1x1xi32>
    %c8_i32_32 = arith.constant 8 : i32
    %85 = vector.broadcast %c8_i32_32 : i32 to vector<6x1x1xi32>
    %86 = arith.cmpi slt, %82, %85 : vector<6x1x1xi32>
    %87 = arith.andi %84, %86 : vector<6x1x1xi1>
    %cst_33 = arith.constant 0.000000e+00 : f32
    %88 = vector.shape_cast %87 : vector<6x1x1xi1> to vector<6x1x1xi1>
    %89 = vector.broadcast %88 : vector<6x1x1xi1> to vector<6x8x8xi1>
    %90 = vector.broadcast %cst_33 : f32 to vector<6x8x8xf32>
    %91 = arith.select %89, %78, %90 : vector<6x8x8xi1>, vector<6x8x8xf32>
    %92 = arith.truncf %91 : vector<6x8x8xf32> to vector<6x8x8xbf16>
    %cst_34 = arith.constant 0.000000e+00 : bf16
    %93 = vector.broadcast %cst_34 : bf16 to vector<1x8x8xbf16>
    %94 = vector.extract_strided_slice %92 {offsets = [0, 0, 0], sizes = [5, 8, 8], strides = [1, 1, 1]} : vector<6x8x8xbf16> to vector<5x8x8xbf16>
    %95 = tpu.concatenate %93, %94 in 0 : vector<1x8x8xbf16>, vector<5x8x8xbf16> -> vector<6x8x8xbf16>
    %cst_35 = arith.constant 0.000000e+00 : bf16
    %96 = vector.broadcast %cst_35 : bf16 to vector<6x1x8xbf16>
    %97 = vector.extract_strided_slice %95 {offsets = [0, 0, 0], sizes = [6, 7, 8], strides = [1, 1, 1]} : vector<6x8x8xbf16> to vector<6x7x8xbf16>
    %98 = tpu.concatenate %96, %97 in 1 : vector<6x1x8xbf16>, vector<6x7x8xbf16> -> vector<6x8x8xbf16>
    %cst_36 = arith.constant 0.000000e+00 : bf16
    %99 = vector.broadcast %cst_36 : bf16 to vector<1x8x8xbf16>
    %100 = vector.extract_strided_slice %92 {offsets = [0, 0, 0], sizes = [5, 8, 8], strides = [1, 1, 1]} : vector<6x8x8xbf16> to vector<5x8x8xbf16>
    %101 = tpu.concatenate %99, %100 in 0 : vector<1x8x8xbf16>, vector<5x8x8xbf16> -> vector<6x8x8xbf16>
    %cst_37 = arith.constant 0.000000e+00 : bf16
    %102 = vector.broadcast %cst_37 : bf16 to vector<1x8x8xbf16>
    %103 = vector.extract_strided_slice %92 {offsets = [0, 0, 0], sizes = [5, 8, 8], strides = [1, 1, 1]} : vector<6x8x8xbf16> to vector<5x8x8xbf16>
    %104 = tpu.concatenate %102, %103 in 0 : vector<1x8x8xbf16>, vector<5x8x8xbf16> -> vector<6x8x8xbf16>
    %105 = vector.extract_strided_slice %104 {offsets = [0, 1, 0], sizes = [6, 7, 8], strides = [1, 1, 1]} : vector<6x8x8xbf16> to vector<6x7x8xbf16>
    %cst_38 = arith.constant 0.000000e+00 : bf16
    %106 = vector.broadcast %cst_38 : bf16 to vector<6x1x8xbf16>
    %107 = tpu.concatenate %105, %106 in 1 : vector<6x7x8xbf16>, vector<6x1x8xbf16> -> vector<6x8x8xbf16>
    %cst_39 = arith.constant 0.000000e+00 : bf16
    %108 = vector.broadcast %cst_39 : bf16 to vector<6x1x8xbf16>
    %109 = vector.extract_strided_slice %92 {offsets = [0, 0, 0], sizes = [6, 7, 8], strides = [1, 1, 1]} : vector<6x8x8xbf16> to vector<6x7x8xbf16>
    %110 = tpu.concatenate %108, %109 in 1 : vector<6x1x8xbf16>, vector<6x7x8xbf16> -> vector<6x8x8xbf16>
    %111 = vector.extract_strided_slice %92 {offsets = [0, 1, 0], sizes = [6, 7, 8], strides = [1, 1, 1]} : vector<6x8x8xbf16> to vector<6x7x8xbf16>
    %cst_40 = arith.constant 0.000000e+00 : bf16
    %112 = vector.broadcast %cst_40 : bf16 to vector<6x1x8xbf16>
    %113 = tpu.concatenate %111, %112 in 1 : vector<6x7x8xbf16>, vector<6x1x8xbf16> -> vector<6x8x8xbf16>
    %114 = vector.extract_strided_slice %92 {offsets = [1, 0, 0], sizes = [5, 8, 8], strides = [1, 1, 1]} : vector<6x8x8xbf16> to vector<5x8x8xbf16>
    %cst_41 = arith.constant 0.000000e+00 : bf16
    %115 = vector.broadcast %cst_41 : bf16 to vector<1x8x8xbf16>
    %116 = tpu.concatenate %114, %115 in 0 : vector<5x8x8xbf16>, vector<1x8x8xbf16> -> vector<6x8x8xbf16>
    %cst_42 = arith.constant 0.000000e+00 : bf16
    %117 = vector.broadcast %cst_42 : bf16 to vector<6x1x8xbf16>
    %118 = vector.extract_strided_slice %116 {offsets = [0, 0, 0], sizes = [6, 7, 8], strides = [1, 1, 1]} : vector<6x8x8xbf16> to vector<6x7x8xbf16>
    %119 = tpu.concatenate %117, %118 in 1 : vector<6x1x8xbf16>, vector<6x7x8xbf16> -> vector<6x8x8xbf16>
    %120 = vector.extract_strided_slice %92 {offsets = [1, 0, 0], sizes = [5, 8, 8], strides = [1, 1, 1]} : vector<6x8x8xbf16> to vector<5x8x8xbf16>
    %cst_43 = arith.constant 0.000000e+00 : bf16
    %121 = vector.broadcast %cst_43 : bf16 to vector<1x8x8xbf16>
    %122 = tpu.concatenate %120, %121 in 0 : vector<5x8x8xbf16>, vector<1x8x8xbf16> -> vector<6x8x8xbf16>
    %123 = vector.extract_strided_slice %92 {offsets = [1, 0, 0], sizes = [5, 8, 8], strides = [1, 1, 1]} : vector<6x8x8xbf16> to vector<5x8x8xbf16>
    %cst_44 = arith.constant 0.000000e+00 : bf16
    %124 = vector.broadcast %cst_44 : bf16 to vector<1x8x8xbf16>
    %125 = tpu.concatenate %123, %124 in 0 : vector<5x8x8xbf16>, vector<1x8x8xbf16> -> vector<6x8x8xbf16>
    %126 = vector.extract_strided_slice %125 {offsets = [0, 1, 0], sizes = [6, 7, 8], strides = [1, 1, 1]} : vector<6x8x8xbf16> to vector<6x7x8xbf16>
    %cst_45 = arith.constant 0.000000e+00 : bf16
    %127 = vector.broadcast %cst_45 : bf16 to vector<6x1x8xbf16>
    %128 = tpu.concatenate %126, %127 in 1 : vector<6x7x8xbf16>, vector<6x1x8xbf16> -> vector<6x8x8xbf16>
    %129 = tpu.concatenate %98, %101, %107, %110, %92, %113, %119, %122, %128 in 2 : vector<6x8x8xbf16>, vector<6x8x8xbf16>, vector<6x8x8xbf16>, vector<6x8x8xbf16>, vector<6x8x8xbf16>, vector<6x8x8xbf16>, vector<6x8x8xbf16>, vector<6x8x8xbf16>, vector<6x8x8xbf16> -> vector<6x8x72xbf16>
    %130 = vector.shape_cast %129 : vector<6x8x72xbf16> to vector<48x72xbf16>
    %c0_46 = arith.constant 0 : index
    %c0_47 = arith.constant 0 : index
    %131 = vector.load %arg8[%c0_46, %c0_47] : memref<72x8xbf16, #tpu.memory_space<vmem>>, vector<72x8xbf16>
    %cst_48 = arith.constant dense<0.000000e+00> : vector<48x8xf32>
    %132 = tpu.matmul %130, %131, %cst_48 {dimension_numbers = #tpu.dot_dimension_numbers<[1], [0], [0], [1], [0, 0, 1, 1], [], []>} : vector<48x72xbf16>, vector<72x8xbf16>, vector<48x8xf32> -> vector<48x8xf32>
    %c0_49 = arith.constant 0 : index
    %c0_50 = arith.constant 0 : index
    %133 = vector.load %arg9[%c0_49, %c0_50] : memref<1x8xf32, #tpu.memory_space<vmem>>, vector<1x8xf32>
    %134 = vector.broadcast %133 : vector<1x8xf32> to vector<48x8xf32>
    %135 = arith.mulf %132, %134 : vector<48x8xf32>
    %c0_51 = arith.constant 0 : index
    %c0_52 = arith.constant 0 : index
    %136 = vector.load %arg10[%c0_51, %c0_52] : memref<1x8xf32, #tpu.memory_space<vmem>>, vector<1x8xf32>
    %137 = vector.broadcast %136 : vector<1x8xf32> to vector<48x8xf32>
    %138 = arith.addf %135, %137 : vector<48x8xf32>
    %cst_53 = arith.constant 0.000000e+00 : f32
    %139 = vector.broadcast %cst_53 : f32 to vector<48x8xf32>
    %140 = arith.maximumf %138, %139 : vector<48x8xf32>
    %141 = vector.shape_cast %140 : vector<48x8xf32> to vector<6x8x8xf32>
    %142 = vector.extract_strided_slice %141 {offsets = [1, 0, 0], sizes = [4, 8, 8], strides = [1, 1, 1]} : vector<6x8x8xf32> to vector<4x8x8xf32>
    %143 = vector.shape_cast %142 : vector<4x8x8xf32> to vector<1x32x8xf32>
    %c0_54 = arith.constant 0 : index
    %c0_55 = arith.constant 0 : index
    %c0_56 = arith.constant 0 : index
    %144 = vector.load %arg11[%c0_54, %c0_55, %c0_56] : memref<1x32x8xf32, #tpu.memory_space<vmem>>, vector<1x32x8xf32>
    tpu.vector_store %arg11[%c0_54, %c0_55, %c0_56], %143 {strides = array<i32>} : memref<1x32x8xf32, #tpu.memory_space<vmem>>, vector<1x32x8xf32>,
    return
  }
  func.func @transform_0(%arg0: i32, %arg1: i32) -> (i32, i32, i32, i32) {
    %c2_i32 = arith.constant 2 : i32
    %0 = arith.muli %arg1, %c2_i32 : i32
    %c1_i32 = arith.constant 1 : i32
    %1 = arith.subi %0, %c1_i32 : i32
    %c0_i32 = arith.constant 0 : i32
    %2 = arith.maxsi %1, %c0_i32 : i32
    %c0_i32_0 = arith.constant 0 : i32
    %c0_i32_1 = arith.constant 0 : i32
    %c0_i32_2 = arith.constant 0 : i32
    return %arg0, %2, %c0_i32_0, %c0_i32_1 : i32, i32, i32, i32
  }
  func.func @transform_1(%arg0: i32, %arg1: i32) -> (i32, i32, i32, i32) {
    %c0_i32 = arith.constant 0 : i32
    %c0_i32_0 = arith.constant 0 : i32
    %c0_i32_1 = arith.constant 0 : i32
    return %arg0, %arg1, %c0_i32, %c0_i32_0 : i32, i32, i32, i32
  }
  func.func @transform_2(%arg0: i32, %arg1: i32) -> (i32, i32, i32, i32) {
    %c1_i32 = arith.constant 1 : i32
    %0 = arith.addi %arg1, %c1_i32 : i32
    %c2_i32 = arith.constant 2 : i32
    %1 = arith.muli %0, %c2_i32 : i32
    %c3_i32 = arith.constant 3 : i32
    %2 = arith.minsi %1, %c3_i32 : i32
    %c0_i32 = arith.constant 0 : i32
    %c0_i32_0 = arith.constant 0 : i32
    %c0_i32_1 = arith.constant 0 : i32
    return %arg0, %2, %c0_i32, %c0_i32_0 : i32, i32, i32, i32
  }
  func.func @transform_3(%arg0: i32, %arg1: i32) -> (i32, i32) {
    %c0_i32 = arith.constant 0 : i32
    %c0_i32_0 = arith.constant 0 : i32
    %c0_i32_1 = arith.constant 0 : i32
    return %c0_i32, %c0_i32_0 : i32, i32
  }
  func.func @transform_4(%arg0: i32, %arg1: i32) -> (i32, i32) {
    %c0_i32 = arith.constant 0 : i32
    %c0_i32_0 = arith.constant 0 : i32
    %c0_i32_1 = arith.constant 0 : i32
    return %c0_i32, %c0_i32_0 : i32, i32
  }
  func.func @transform_5(%arg0: i32, %arg1: i32) -> (i32, i32) {
    %c0_i32 = arith.constant 0 : i32
    %c0_i32_0 = arith.constant 0 : i32
    %c0_i32_1 = arith.constant 0 : i32
    return %c0_i32, %c0_i32_0 : i32, i32
  }
  func.func @transform_6(%arg0: i32, %arg1: i32) -> (i32, i32) {
    %c0_i32 = arith.constant 0 : i32
    %c0_i32_0 = arith.constant 0 : i32
    %c0_i32_1 = arith.constant 0 : i32
    return %c0_i32, %c0_i32_0 : i32, i32
  }
  func.func @transform_7(%arg0: i32, %arg1: i32) -> (i32, i32) {
    %c0_i32 = arith.constant 0 : i32
    %c0_i32_0 = arith.constant 0 : i32
    %c0_i32_1 = arith.constant 0 : i32
    return %c0_i32, %c0_i32_0 : i32, i32
  }
  func.func @transform_8(%arg0: i32, %arg1: i32) -> (i32, i32) {
    %c0_i32 = arith.constant 0 : i32
    %c0_i32_0 = arith.constant 0 : i32
    %c0_i32_1 = arith.constant 0 : i32
    return %c0_i32, %c0_i32_0 : i32, i32
  }
  func.func @transform_9(%arg0: i32, %arg1: i32) -> (i32, i32, i32) {
    %c0_i32 = arith.constant 0 : i32
    %c0_i32_0 = arith.constant 0 : i32
    return %arg0, %arg1, %c0_i32 : i32, i32, i32
  }
}

</mosaic_0001>

<bundles_post_ra>
// kernel: down_forward.1
= control target key start
LH: loop header
LB: loop body
LE: loop exit
PB: predicated region body
PF: predicated region fallthrough
CT: control target
= control target key end

     0   :  { %s2270_s30 = smov 0   ;;  %s2272_s10 = smov 0   ;;  %s3080_s0 = inlined_call_operand.vmem [shape: bf16[2,8,8,16], index: 0, kind: input, shape index: {}, may-alias: {0,1,2}]   ;;  %s3081_s1 = inlined_call_operand.vmem [shape: bf16[2,8,8,16], index: 1, kind: input, shape index: {}, may-alias: {0,1,2}]   ;;  %s3082_s2 = inlined_call_operand.vmem [shape: bf16[2,8,8,16], index: 2, kind: input, shape index: {}, may-alias: {0,1,2}]   ;;  %s3083_s3 = inlined_call_operand.vmem [shape: bf16[36,8], index: 3, kind: input, shape index: {}]   ;;  %s3084_s4 = inlined_call_operand.vmem [shape: f32[1,8], index: 4, kind: input, shape index: {}]   ;;  %s3085_s5 = inlined_call_operand.vmem [shape: f32[1,8], index: 5, kind: input, shape index: {}]   ;;  %s3086_s6 = inlined_call_operand.vmem [shape: bf16[72,8], index: 6, kind: input, shape index: {}]   ;;  %s3087_s7 = inlined_call_operand.vmem [shape: f32[1,8], index: 7, kind: input, shape index: {}]   ;;  %s3088_s8 = inlined_call_operand.vmem [shape: f32[1,8], index: 8, kind: input, shape index: {}]   ;;  %s3089_s9 = inlined_call_operand.vmem [shape: f32[2,64,8], index: 9, kind: output, shape index: {}]  }
   0x1   :  { %s2274_s11 = smov 0   ;;  %s2276_s12 = smov 0  }
   0x2   :  { %s2278_s13 = smov 0  }
   0x3 LB: > { %s28_s14 = sadd.s32 1, %s2193_s11  ;;  %s31_s15 = sadd.s32 1, %s2197_s12  ;;  %s2201_s13 = sphi %s2278_s13, %s19_s13   ;;  %s2197_s12 = sphi %s2276_s12, %s3097_s12   ;;  %s2193_s11 = sphi %s2274_s11, %s3096_s11   ;;  %s2189_s10 = sphi %s2272_s10, %s3095_s10   ;;  %s2185_s30 = sphi %s2270_s30, %s3094_s30  }
   0x4   : > { %p29_p0 = scmp.ge.s32.totalorder %s28_s14, 2  ;;  %p1984_p1 = scmp.ge.s32.totalorder %s2201_s13, 1 }
   0x5   : > { %p374_p2 = scmp.lt.s32.totalorder %s2201_s13, 5 }
   0x6   : > { %s3099_s14 = smov (%p29_p0, %s28_s14), 0  ;;  %s3101_s15 = smov (!%p29_p0, %s31_s15), %s2197_s12 }
   0x7   : > { %p375_p3 = pnand %p1984_p1, %p374_p2  ;;  %p33_p4 = scmp.ge.s32.totalorder %s3101_s15, 2 }
   0x8   : > { %p449_p5 = scmp.lt.s32.totalorder (!%p375_p3), %s2189_s10, 1  ;;  %s2303_s16 = sshll.u32 (!%p375_p3), %s2185_s30, 2 }
   0x9   : > { %s3103_s15 = smov (%p33_p4, %s3101_s15), 0  ;;  %378 = sbr.rel (%p375_p3) target bundleno = 1087 (0x43f), region = 56 }
   0xa   : > { %p465_p6 = scmp.lt.s32.totalorder (!%p375_p3), %s2303_s16, 7  ;;  %s2203_s24 = smov (!%p375_p3), 124  }
   0xb   : > { %s1985_s25 = sshll.u32 (!%p375_p3), %s2185_s30, 1  ;;  %s2212_s21 = smov (!%p375_p3), 20  }
   0xc   : > { %s1986_s26 = sadd.s32 (!%p375_p3), 4294967295, %s1985_s25  ;;  %s2045_s27 = sadd.s32 (!%p375_p3), 2, %s1985_s25 }
   0xd   : > { %p446_p7 = scmp.gt.s32.totalorder (!%p375_p3), %s1986_s26, 0  ;;  %p474_p8 = scmp.lt.s32.totalorder (!%p375_p3), %s2045_s27, 3 }
   0xe   : > { %s3105_s10 = smov (!%p449_p5, %s2189_s10), 1  ;;  %v2204_v3 = vmov 0   ;;  %vm711_vm0 = vcmask 1040384   ;;  %vm712_vm1 = vsmask.f32 256  ;;  %vm746_vm3 = vcmask 1043456  }
   0xf   : > { %s466_s17 = scalar_select %p465_p6, %s2303_s16, 7  ;;  %v2321_v4 = vcombine.low %v2204_v3, %v2204_v3  ;;  %vm2339_vm2 = vmand %vm711_vm0, %vm712_vm1  ;;  %vm747_vm4 = vsmask.f32 3328  ;;  %v722_v16 = vrot.slane %v2204_v3, 1 }
  0x10   : > { %s2307_s18 = sshll.u32 %s3105_s10, 3  ;;  %s3107_s26 = smov (!%p446_p7, %s1986_s26), 0  ;;  %vm2354_vm5 = vmand %vm746_vm3, %vm747_vm4 }
  0x11   : > { %s2310_s19 = sadd.s32 %s2307_s18, %s466_s17  ;;  %s3109_s27 = smov (!%p474_p8, %s2045_s27), 3  ;;  %v889_v6 = vshrl.u32 %v2321_v4, 16  ;;  %v892_v8 = vshll.u32 %v2321_v4, 16  ;;  %v2362_v18 = vsel %vm2354_vm5, %v722_v16, 0 }
  0x12   : > { %s1992_s20 = sshll.u32 %s2310_s19, 2  ;;  %s1987_s28 = sshll.u32 %s3107_s26, 1 }
  0x13   : > { %s470_s23 = scalar_lea.vmem %s3081_s1, %s1992_s20  ;;  %p451_p9 = scmp.lt.s32.totalorder %s1987_s28, 7  ;;  %v891_v7 = vrot.slane %v889_v6, 7 }
  0x14   : > { %v504_v0 = vld [vmem:[%s470_s23] sm:$0xf]  ;;  %v506_v1 = vld [vmem:[%s470_s23 + $0x8] sm:$0xf]  ;;  %v505_v2 = vld [vmem:[%s470_s23 + $0x4] sm:$0xf] }
  0x15   : > { %522 = vrot.lane.b32.xlu1 %v504_v0, %s2203_s24  ;;  %526 = vrot.lane.b32.xlu0 %v506_v1, %s2203_s24  ;;  %v507_v5 = vld [vmem:[%s470_s23 + $0xc] sm:$0xf]  ;;  %s1994_s29 = sshll.u32 %s3109_s27, 1  ;;  %s3111_s28 = smov (!%p451_p9, %s1987_s28), 7  ;;  %v894_v9 = vor.u32 %v892_v8, %v891_v7 }
  0x16   : > { %p479_p10 = scmp.lt.s32.totalorder %s1994_s29, 7  ;;  %s454_s30 = sadd.s32 %s2307_s18, %s3111_s28 }
  0x17   : > { %s1989_s10 = sshll.u32 %s454_s30, 2  ;;  %v896_v14 = vsel %vm2339_vm2, 0, %v894_v9  ;;  %s2206_s28 = smov 28  }
  0x18   : > { %s3113_s29 = smov (!%p479_p10, %s1994_s29), 7  ;;  %s456_s22 = scalar_lea.vmem %s3080_s0, %s1989_s10 }
  0x19   : > { %524 = vrot.lane.b32.xlu1 %v505_v2, %s2203_s24  ;;  %s482_s17 = sadd.s32 %s2307_s18, %s3113_s29  ;;  %v502_v10 = vld [vmem:[%s456_s22] sm:$0xf]  ;;  %v503_v13 = vld [vmem:[%s456_s22 + $0x4] sm:$0xf]  ;;  %s2205_s18 = smov 24  }
  0x1a   : > { %s1996_s23 = sshll.u32 %s482_s17, 2  ;;  %518 = vrot.lane.b32.xlu0 %v502_v10, %s2203_s24  ;;  %s2207_s29 = smov 4  }
  0x1b   : > { %s484_s27 = scalar_lea.vmem %s3082_s2, %s1996_s23  ;;  %s2209_s30 = smov 120  }
  0x1c   : > { %v509_v12 = vld [vmem:[%s484_s27 + $0x4] sm:$0xf]  ;;  %v508_v15 = vld [vmem:[%s484_s27] sm:$0xf]  ;;  %s2001_s10 = sadd.s32 4294967294, %s2303_s16  ;;  %s2210_s17 = smov 16  }
  0x1d   : > { %528 = vrot.lane.b32.xlu1 %v507_v5, %s2203_s24  ;;  %v2381_v36 = vstv %s2001_s10  ;;  %s2211_s20 = smov 12   ;;  %s2213_s22 = smov 32  }
  0x1e   : > { %520 = vrot.lane.b32.xlu0 %v503_v13, %s2203_s24  ;;  %v593_v38 = vadd.s32 2, %v2381_v36  ;;  %v594_v40 = vadd.s32 3, %v2381_v36  ;;  %v595_v41 = vadd.s32 4, %v2381_v36  ;;  %v596_v45 = vadd.s32 5, %v2381_v36  ;;  %s2024_s10 = sadd.s32 4294967295, %s2303_s16  ;;  %s2215_s16 = smov 56  }
  0x1f   : > { %v592_v58 = vadd.s32 1, %v2381_v36  ;;  %v597_v59 = vadd.s32 6, %v2381_v36  ;;  %vm599_vm4 = vcmp.ge.s32.totalorder %v2381_v36, 0  ;;  %s2216_s26 = smov 64   ;;  %s2217_s27 = smov 40  }
  0x20   : > { %vm601_vm6 = vcmp.ge.s32.totalorder %v593_v38, 0  ;;  %vm609_vm7 = vcmp.lt.s32.totalorder %v593_v38, 8  ;;  %vm602_vm9 = vcmp.ge.s32.totalorder %v594_v40, 0  ;;  %vm610_vm10 = vcmp.lt.s32.totalorder %v594_v40, 8 }
  0x21   : > { %532 = vrot.lane.b32.xlu1 %v509_v12, %s2203_s24  ;;  %vm617_vm8 = vmand %vm601_vm6, %vm609_vm7  ;;  %vm603_vm11 = vcmp.ge.s32.totalorder %v595_v41, 0  ;;  %vm611_vm12 = vcmp.lt.s32.totalorder %v595_v41, 8  ;;  %vm604_vm15 = vcmp.ge.s32.totalorder %v596_v45, 0  ;;  %vm612_vm0 = vcmp.lt.s32.totalorder %v596_v45, 8 }
  0x22   : > { %530 = vrot.lane.b32.xlu0 %v508_v15, %s2203_s24  ;;  %s2208_s24 = smov 8   ;;  %vm618_vm13 = vmand %vm602_vm9, %vm610_vm10  ;;  %vm607_vm6 = vcmp.lt.s32.totalorder %v2381_v36, 8  ;;  %vm600_vm7 = vcmp.ge.s32.totalorder %v592_v58, 0  ;;  %vm605_vm9 = vcmp.ge.s32.totalorder %v597_v59, 0  ;;  %vm613_vm10 = vcmp.lt.s32.totalorder %v597_v59, 8 }
  0x23   : > { %vm619_vm14 = vmand %vm603_vm11, %vm611_vm12 }
  0x24   : > { %vm620_vm1 = vmand %vm604_vm15, %vm612_vm0 }
  0x25   : > { %1020 = vrot.lane.b32.xlu1 %v896_v14, %s2205_s18  ;;  %vm615_vm11 = vmand %vm599_vm4, %vm607_vm6  ;;  %vm1055_vm4 = vcmask 31744   ;;  %vm1080_vm6 = vcmask 64512  }
  0x26   : > { %901 = vrot.lane.b32.xlu0 %v2204_v3, %s2207_s29  ;;  %vm621_vm12 = vmand %vm605_vm9, %vm613_vm10  ;;  %vm1131_vm9 = vcmask 162816   ;;  %vm1148_vm10 = vcmask 195584  }
  0x29   : > { %1036 = vrot.lane.b32.xlu1 %v2321_v4, %s2206_s28 }
  0x2a   : > { %925 = vrot.lane.b32.xlu0 %v2362_v18, %s2208_s24 }
  0x87   : > { %v523_v19 = vpop.permute.xlu1 %522  ;;  %v527_v21 = vpop.permute.xlu0 %526 }
  0x88   : > { %v544_v20 = vmax.bf16 %v523_v19, %v504_v0  ;;  %v546_v22 = vmax.bf16 %v527_v21, %v506_v1 }
  0x8a   : > { %562 = vrot.lane.b32.xlu0 %v544_v20, %s2209_s30 }
  0x8b   : > { %v525_v23 = vpop.permute.xlu1 %524 }
  0x8c   : > { %v545_v24 = vmax.bf16 %v525_v23, %v505_v2  ;;  %v519_v27 = vpop.permute.xlu0 %518 }
  0x8d   : > { %v2366_v28 = vmax.bf16 %v519_v27, %v502_v10 }
  0x8e   : > { %564 = vrot.lane.b32.xlu1 %v545_v24, %s2209_s30  ;;  %566 = vrot.lane.b32.xlu0 %v546_v22, %s2209_s30 }
  0x8f   : > { %v529_v25 = vpop.permute.xlu1 %528 }
  0x90   : > { %v547_v26 = vmax.bf16 %v529_v25, %v507_v5  ;;  %v521_v29 = vpop.permute.xlu0 %520 }
  0x91   : > { %v2369_v31 = vmax.bf16 %v521_v29, %v503_v13 }
  0x92   : > { %568 = vrot.lane.b32.xlu1 %v547_v26, %s2209_s30  ;;  %558 = vrot.lane.b32.xlu0 %v2366_v28, %s2209_s30 }
  0x93   : > { %v533_v30 = vpop.permute.xlu1 %532 }
  0x94   : > { %v2372_v32 = vmax.bf16 %v533_v30, %v509_v12  ;;  %v531_v33 = vpop.permute.xlu0 %530 }
  0x95   : > { %v2374_v34 = vmax.bf16 %v531_v33, %v508_v15  ;;  %v598_v33 = vadd.s32 7, %v2381_v36 }
  0x96   : > { %560 = vrot.lane.b32.xlu1 %v2369_v31, %s2209_s30 }
  0x97   : > { %570 = vrot.lane.b32.xlu0 %v2374_v34, %s2209_s30  ;;  %v2383_v37 = vpop.permute.xlu1 %1020  ;;  %vm614_vm15 = vcmp.lt.s32.totalorder %v598_v33, 8 }
  0x98   : > { %v2379_v35 = vpop.permute.xlu0 %901 }
  0x9a   : > { %572 = vrot.lane.b32.xlu1 %v2372_v32, %s2209_s30  ;;  %s2214_s30 = smov 48  }
  0x9b   : > { %v2390_v42 = vpop.permute.xlu1 %1036 }
  0x9c   : > { %v2386_v39 = vpop.permute.xlu0 %925 }
  0xfc   : > { %v563_v43 = vpop.permute.xlu0 %562 }
  0xfd   : > { %v584_v44 = vmax.bf16 %v563_v43, %v544_v20 }
  0xff   : > { %v2393_v46 = vsel %vm617_vm8, %v584_v44, 0  ;;  %vm608_vm8 = vcmp.lt.s32.totalorder %v592_v58, 8 }
 0x100   : > { %v565_v47 = vpop.permute.xlu1 %564  ;;  %907 = vrot.lane.b32.xlu1 %v2393_v46, %s2207_s29  ;;  %v567_v48 = vpop.permute.xlu0 %566  ;;  %v2417_v57 = vcombine.low %v2393_v46, %v2393_v46  ;;  %v672_v63 = vshll.u32 %v2393_v46, 16  ;;  %v669_v19 = vshrl.u32 %v2393_v46, 16 }
 0x101   : > { %v585_v49 = vmax.bf16 %v565_v47, %v545_v24  ;;  %v586_v50 = vmax.bf16 %v567_v48, %v546_v22 }
 0x102   : > { %v728_v14 = vrot.slane %v672_v63, 1  ;;  %v671_v29 = vrot.slane %v669_v19, 7 }
 0x103   : > { %v2397_v51 = vsel %vm618_vm13, %v585_v49, 0  ;;  %v2399_v52 = vsel %vm619_vm14, %v586_v50, 0  ;;  %vm616_vm13 = vmand %vm600_vm7, %vm608_vm8  ;;  %vm606_vm14 = vcmp.ge.s32.totalorder %v598_v33, 0  ;;  %vm1097_vm7 = vcmask 97280  }
 0x104   : > { %v569_v53 = vpop.permute.xlu1 %568  ;;  %909 = vrot.lane.b32.xlu0 %v2397_v51, %s2207_s29  ;;  %911 = vrot.lane.b32.xlu1 %v2399_v52, %s2207_s29  ;;  %v2407_v55 = vcombine.low %v2397_v51, %v2397_v51  ;;  %v2427_v60 = vcombine.low %v2399_v52, %v2399_v52  ;;  %v559_v61 = vpop.permute.xlu0 %558  ;;  %v679_v0 = vshll.u32 %v2397_v51, 16  ;;  %v686_v10 = vshll.u32 %v2399_v52, 16  ;;  %vm622_vm0 = vmand %vm606_vm14, %vm614_vm15 }
 0x105   : > { %v587_v54 = vmax.bf16 %v569_v53, %v547_v26  ;;  %v582_v1 = vmax.bf16 %v559_v61, %v2366_v28  ;;  %v676_v21 = vshrl.u32 %v2397_v51, 16  ;;  %v683_v22 = vshrl.u32 %v2399_v52, 16 }
 0x106   : > { %v730_v13 = vrot.slane %v679_v0, 1  ;;  %v729_v26 = vor.u32 %v728_v14, %v669_v19  ;;  %v732_v27 = vrot.slane %v686_v10, 1  ;;  %v2484_v49 = vor.u32 %v672_v63, %v671_v29 }
 0x107   : > { %v2409_v56 = vsel %vm620_vm1, %v587_v54, 0  ;;  %v2450_v12 = vsel %vm615_vm11, %v582_v1, 0  ;;  %v678_v38 = vrot.slane %v676_v21, 7  ;;  %v796_v14 = vshrl.u32 %v2417_v57, 16 }
 0x108   : > { %913 = vrot.lane.b32.xlu0 %v2409_v56, %s2207_s29  ;;  %971 = vrot.lane.b32.xlu1 %v2407_v55, %s2210_s17  ;;  %v561_v62 = vpop.permute.xlu1 %560  ;;  %v2440_v2 = vcombine.low %v2409_v56, %v2409_v56  ;;  %v693_v15 = vshll.u32 %v2409_v56, 16  ;;  %v690_v23 = vshrl.u32 %v2409_v56, 16  ;;  %v655_v24 = vshrl.u32 %v2450_v12, 16 }
 0x109   : > { %v571_v5 = vpop.permute.xlu0 %570  ;;  %v583_v7 = vmax.bf16 %v561_v62, %v2369_v31  ;;  %v731_v25 = vor.u32 %v730_v13, %v676_v21  ;;  %v752_v44 = vsel %vm2354_vm5, %v729_v26, 0  ;;  %v733_v45 = vor.u32 %v732_v27, %v683_v22 }
 0x10a   : > { %v588_v9 = vmax.bf16 %v571_v5, %v2374_v34  ;;  %v734_v30 = vrot.slane %v693_v15, 1  ;;  %v685_v34 = vrot.slane %v683_v22, 7  ;;  %v692_v40 = vrot.slane %v690_v23, 7 }
 0x10b   : > { %v2460_v20 = vsel %vm616_vm13, %v583_v7, 0  ;;  %v657_v41 = vrot.slane %v655_v24, 7  ;;  %v753_v43 = vsel %vm2354_vm5, %v731_v25, 0  ;;  %v658_v46 = vshll.u32 %v2450_v12, 16 }
 0x10c   : > { %969 = vrot.lane.b32.xlu0 %v2417_v57, %s2210_s17  ;;  %1024 = vrot.lane.b32.xlu1 %v2417_v57, %s2206_s28  ;;  %v2453_v16 = vsel %vm621_vm12, %v588_v9, 0  ;;  %v662_v31 = vshrl.u32 %v2460_v20, 16  ;;  %v735_v47 = vor.u32 %v734_v30, %v690_v23  ;;  %v573_v50 = vpop.permute.xlu1 %572  ;;  %v2489_v52 = vor.u32 %v686_v10, %v685_v34 }
 0x10d   : > { %v697_v28 = vshrl.u32 %v2453_v16, 16  ;;  %v700_v51 = vshll.u32 %v2453_v16, 16  ;;  %v665_v53 = vshll.u32 %v2460_v20, 16  ;;  %v2492_v54 = vor.u32 %v679_v0, %v678_v38 }
 0x10e   : > { %v664_v48 = vrot.slane %v662_v31, 7  ;;  %v2494_v56 = vor.u32 %v693_v15, %v692_v40  ;;  %v2498_v58 = vor.u32 %v658_v46, %v657_v41  ;;  %v589_v61 = vmax.bf16 %v573_v50, %v2372_v32 }
 0x10f   : > { %v699_v36 = vrot.slane %v697_v28, 7  ;;  %v755_v62 = vsel %vm2354_vm5, %v735_v47, 0  ;;  %v754_v63 = vsel %vm2354_vm5, %v733_v45, 0  ;;  %v2519_v32 = vcombine.low %v2450_v12, %v2450_v12 }
 0x110   : > { %1026 = vrot.lane.b32.xlu0 %v2407_v55, %s2206_s28  ;;  %1028 = vrot.lane.b32.xlu1 %v2427_v60, %s2206_s28  ;;  %v2511_v0 = vor.u32 %v665_v53, %v664_v48  ;;  %v2523_v1 = vcombine.low %v2460_v20, %v2460_v20  ;;  %v646_v5 = vsel %vm622_vm0, %v589_v61, 0  ;;  %v803_v7 = vshrl.u32 %v2407_v55, 16 }
 0x111   : > { %v2502_v59 = vor.u32 %v700_v51, %v699_v36  ;;  %v2530_v9 = vcombine.low %v646_v5, %v646_v5  ;;  %v806_v13 = vshll.u32 %v2407_v55, 16  ;;  %v2540_v15 = vcombine.low %v2453_v16, %v2453_v16 }
 0x112   : > { %v805_v10 = vrot.slane %v803_v7, 7  ;;  %v799_v19 = vshll.u32 %v2417_v57, 16  ;;  %v798_v23 = vrot.slane %v796_v14, 7  ;;  %v810_v29 = vshrl.u32 %v2427_v60, 16 }
 0x113   : > { %v859_v22 = vrot.slane %v806_v13, 1  ;;  %v813_v38 = vshll.u32 %v2427_v60, 16  ;;  %v817_v45 = vshrl.u32 %v2440_v2, 16  ;;  %v820_v47 = vshll.u32 %v2440_v2, 16 }
 0x114   : > { %973 = vrot.lane.b32.xlu0 %v2427_v60, %s2210_s17  ;;  %975 = vrot.lane.b32.xlu1 %v2440_v2, %s2210_s17  ;;  %v808_v21 = vor.u32 %v806_v13, %v805_v10  ;;  %v857_v55 = vrot.slane %v799_v19, 1  ;;  %v801_v27 = vor.u32 %v799_v19, %v798_v23  ;;  %v812_v34 = vrot.slane %v810_v29, 7  ;;  %v2155_v23 = vld [vmem:[%s3083_s3 + $0x10] ss:$0 sps:$4 sm:$0x33]  }
 0x115   : > { %v860_v26 = vor.u32 %v859_v22, %v803_v7  ;;  %v819_v60 = vrot.slane %v817_v45, 7  ;;  %v863_v61 = vrot.slane %v820_v47, 1  ;;  %v726_v7 = vrot.slane %v665_v53, 1 }
 0x116   : > { %v848_v25 = vsel %vm2339_vm2, 0, %v808_v21  ;;  %v847_v30 = vsel %vm2339_vm2, 0, %v801_v27  ;;  %v858_v33 = vor.u32 %v857_v55, %v796_v14  ;;  %v815_v41 = vor.u32 %v813_v38, %v812_v34 }
 0x117   : > { %v880_v57 = vsel %vm2354_vm5, %v860_v26, 0  ;;  %v822_v50 = vor.u32 %v820_v47, %v819_v60  ;;  %v782_v10 = vshrl.u32 %v2519_v32, 16  ;;  %v789_v14 = vshrl.u32 %v2523_v1, 16  ;;  %v2156_v26 = vld [vmem:[%s3083_s3 + $0x8] sm:$0xff]  }
 0x118   : > { %1030 = vrot.lane.b32.xlu0 %v2440_v2, %s2206_s28  ;;  %903 = vrot.lane.b32.xlu1 %v2450_v12, %s2207_s29  ;;  %v879_v40 = vsel %vm2354_vm5, %v858_v33, 0  ;;  %v785_v21 = vshll.u32 %v2519_v32, 16  ;;  %vm1252_vm1 = vcmask 1041408   ;;  %v827_v47 = vshll.u32 %v2540_v15, 16 }
 0x119   : > { %v850_v2 = vsel %vm2339_vm2, 0, %v822_v50  ;;  %v784_v53 = vrot.slane %v782_v10, 7  ;;  %v791_v22 = vrot.slane %v789_v14, 7  ;;  %2097 = vmatprep.subr.msk.bf16.mxu0 %vm1252_vm1, %v2155_v23  ;;  %vm1114_vm8 = vcmask 130048  }
 0x11a   : > { %v853_v55 = vrot.slane %v785_v21, 1  ;;  %vm1165_vm11 = vcmask 228352   ;;  %vm1182_vm12 = vcmask 261120   ;;  %vm1239_vm13 = vcmask 293888  }
 0x11c   : > { %905 = vrot.lane.b32.xlu0 %v2460_v20, %s2207_s29  ;;  %915 = vrot.lane.b32.xlu1 %v2453_v16, %s2207_s29  ;;  %v831_v16 = vshrl.u32 %v2530_v9, 16  ;;  %v854_v33 = vor.u32 %v853_v55, %v782_v10  ;;  %v718_v55 = vsel %vm2339_vm2, 0, %v2492_v54 }
 0x11e   : > { %v833_v27 = vrot.slane %v831_v16, 7 }
 0x120   : > { %933 = vrot.lane.b32.xlu0 %v753_v43, %s2208_s24  ;;  %931 = vrot.lane.b32.xlu1 %v752_v44, %s2208_s24  ;;  %v849_v43 = vsel %vm2339_vm2, 0, %v815_v41  ;;  %v861_v44 = vrot.slane %v813_v38, 1  ;;  %v2157_v38 = vld [vmem:[%s3083_s3] sm:$0xff]  }
 0x122   : > { %v862_v36 = vor.u32 %v861_v44, %v810_v29  ;;  %v834_v29 = vshll.u32 %v2530_v9, 16  ;;  %v824_v44 = vshrl.u32 %v2540_v15, 16 }
 0x124   : > { %937 = vrot.lane.b32.xlu0 %v755_v62, %s2208_s24  ;;  %935 = vrot.lane.b32.xlu1 %v754_v63, %s2208_s24  ;;  %v881_v48 = vsel %vm2354_vm5, %v862_v36, 0  ;;  %v724_v62 = vrot.slane %v658_v46, 1  ;;  %v864_v63 = vor.u32 %v863_v61, %v817_v45  ;;  %v736_v46 = vrot.slane %v700_v51, 1 }
 0x125   : > { %v792_v51 = vshll.u32 %v2523_v1, 16  ;;  %v826_v60 = vrot.slane %v824_v44, 7  ;;  %v865_v61 = vrot.slane %v827_v47, 1 }
 0x126   : > { %v725_v5 = vor.u32 %v724_v62, %v655_v24  ;;  %v882_v13 = vsel %vm2354_vm5, %v864_v63, 0  ;;  %v727_v24 = vor.u32 %v726_v7, %v662_v31  ;;  %v737_v19 = vor.u32 %v736_v46, %v697_v28 }
 0x127   : > { %v787_v31 = vor.u32 %v785_v21, %v784_v53  ;;  %v1254_v28 = vsel %vm1252_vm1, %v2155_v23, 0  ;;  %v829_v50 = vor.u32 %v827_v47, %v826_v60  ;;  %v897_v62 = vrot.slane %v892_v8, 1 }
 0x128   : > { %965 = vrot.lane.b32.xlu0 %v2519_v32, %s2210_s17  ;;  %967 = vrot.lane.b32.xlu1 %v2523_v1, %s2210_s17  ;;  %v750_v12 = vsel %vm2354_vm5, %v725_v5, 0  ;;  %v751_v20 = vsel %vm2354_vm5, %v727_v24, 0  ;;  %v756_v32 = vsel %vm2354_vm5, %v737_v19, 0 }
 0x129   : > { %2062 = vmatpush3.bf16.msra.mxu0 %v1254_v28  ;;  %v898_v63 = vor.u32 %v897_v62, %v889_v6 }
 0x12a   : > { %2063 = vmatprep.subr.bf16.mxu0 %v2156_v26 }
 0x12b   : > { %v900_v8 = vsel %vm2354_vm5, %v898_v63, 0 }
 0x12c   : > { %1022 = vrot.lane.b32.xlu0 %v2523_v1, %s2206_s28  ;;  %979 = vrot.lane.b32.xlu1 %v2530_v9, %s2210_s17  ;;  %v794_v1 = vor.u32 %v792_v51, %v791_v22  ;;  %v715_v22 = vsel %vm2339_vm2, 0, %v2498_v58  ;;  %v717_v58 = vsel %vm2339_vm2, 0, %v2484_v49  ;;  %v720_v49 = vsel %vm2339_vm2, 0, %v2494_v56 }
 0x12d   : > { %2064 = vmatpush3.bf16.msra.mxu0 %v2156_v26 }
 0x12e   : > { %2065 = vmatprep.subr.bf16.mxu0 %v2157_v38 }
 0x130   : > { %1032 = vrot.lane.b32.xlu1 %v2540_v15, %s2206_s28  ;;  %977 = vrot.lane.b32.xlu0 %v2540_v15, %s2210_s17  ;;  %v866_v15 = vor.u32 %v865_v61, %v824_v44 }
 0x131   : > { %2066 = vmatpush3.bf16.msra.mxu0 %v2157_v38 }
 0x132   : > { %v883_v5 = vsel %vm2354_vm5, %v866_v15, 0 }
 0x134   : > { %955 = vrot.lane.b32.xlu1 %v848_v25, %s2211_s20  ;;  %1034 = vrot.lane.b32.xlu0 %v2530_v9, %s2206_s28  ;;  %v877_v9 = vsel %vm2354_vm5, %v854_v33, 0 }
 0x138   : > { %995 = vrot.lane.b32.xlu1 %v880_v57, %s2212_s21  ;;  %953 = vrot.lane.b32.xlu0 %v847_v30, %s2211_s20 }
 0x13c   : > { %1008 = vrot.lane.b32.xlu1 %v847_v30, %s2205_s18  ;;  %993 = vrot.lane.b32.xlu0 %v879_v40, %s2212_s21  ;;  %v846_v30 = vsel %vm2339_vm2, 0, %v794_v1 }
 0x140   : > { %1012 = vrot.lane.b32.xlu1 %v849_v43, %s2205_s18  ;;  %1010 = vrot.lane.b32.xlu0 %v848_v25, %s2205_s18  ;;  %v855_v25 = vrot.slane %v792_v51, 1 }
 0x142   : > { %v856_v34 = vor.u32 %v855_v25, %v789_v14 }
 0x144   : > { %1041 = vrot.lane.b32.xlu1 %v879_v40, %s2213_s22  ;;  %1043 = vrot.lane.b32.xlu0 %v880_v57, %s2213_s22  ;;  %v845_v57 = vsel %vm2339_vm2, 0, %v787_v31  ;;  %v867_v40 = vrot.slane %v834_v29, 1  ;;  %v878_v41 = vsel %vm2354_vm5, %v856_v34, 0  ;;  %v721_v31 = vsel %vm2339_vm2, 0, %v2502_v59 }
 0x146   : > { %v868_v36 = vor.u32 %v867_v40, %v831_v16  ;;  %v716_v16 = vsel %vm2339_vm2, 0, %v2511_v0 }
 0x148   : > { %1045 = vrot.lane.b32.xlu1 %v881_v48, %s2213_s22  ;;  %957 = vrot.lane.b32.xlu0 %v849_v43, %s2211_s20  ;;  %v836_v43 = vor.u32 %v834_v29, %v833_v27 }
 0x14a   : > { %v852_v45 = vsel %vm2339_vm2, 0, %v836_v43 }
 0x14c   : > { %959 = vrot.lane.b32.xlu1 %v850_v2, %s2211_s20  ;;  %997 = vrot.lane.b32.xlu0 %v881_v48, %s2212_s21  ;;  %v884_v48 = vsel %vm2354_vm5, %v868_v36, 0 }
 0x150   : > { %999 = vrot.lane.b32.xlu1 %v882_v13, %s2212_s21  ;;  %1014 = vrot.lane.b32.xlu0 %v850_v2, %s2205_s18  ;;  %v851_v2 = vsel %vm2339_vm2, 0, %v829_v50 }
 0x154   : > { %927 = vrot.lane.b32.xlu1 %v750_v12, %s2208_s24  ;;  %1047 = vrot.lane.b32.xlu0 %v882_v13, %s2213_s22 }
 0x158   : > { %929 = vrot.lane.b32.xlu0 %v751_v20, %s2208_s24  ;;  %939 = vrot.lane.b32.xlu1 %v756_v32, %s2208_s24 }
 0x15c   : > { %949 = vrot.lane.b32.xlu0 %v845_v57, %s2211_s20  ;;  %951 = vrot.lane.b32.xlu1 %v846_v30, %s2211_s20  ;;  %v719_v57 = vsel %vm2339_vm2, 0, %v2489_v52 }
 0x160   : > { %989 = vrot.lane.b32.xlu0 %v877_v9, %s2212_s21  ;;  %991 = vrot.lane.b32.xlu1 %v878_v41, %s2212_s21 }
 0x164   : > { %1006 = vrot.lane.b32.xlu0 %v846_v30, %s2205_s18  ;;  %963 = vrot.lane.b32.xlu1 %v852_v45, %s2211_s20 }
 0x168   : > { %1039 = vrot.lane.b32.xlu0 %v878_v41, %s2213_s22  ;;  %1003 = vrot.lane.b32.xlu1 %v884_v48, %s2212_s21 }
 0x16c   : > { %961 = vrot.lane.b32.xlu0 %v851_v2, %s2211_s20  ;;  %1016 = vrot.lane.b32.xlu1 %v851_v2, %s2205_s18 }
 0x170   : > { %1001 = vrot.lane.b32.xlu0 %v883_v5, %s2212_s21  ;;  %1049 = vrot.lane.b32.xlu1 %v883_v5, %s2213_s22 }
 0x172   : > { %v908_v7 = vpop.permute.xlu1 %907 }
 0x173   : > { %v1067_v59 = vsel %vm1055_vm4, %v717_v58, %v908_v7 }
 0x174   : > { %1018 = vrot.lane.b32.xlu0 %v852_v45, %s2205_s18  ;;  %1053 = vrot.lane.b32.xlu1 %v900_v8, %s2213_s22 }
 0x176   : > { %v912_v10 = vpop.permute.xlu1 %911  ;;  %v910_v13 = vpop.permute.xlu0 %909 }
 0x177   : > { %v1070_v25 = vsel %vm1055_vm4, %v718_v55, %v910_v13  ;;  %v1073_v54 = vsel %vm1055_vm4, %v719_v57, %v912_v10 }
 0x178   : > { %1051 = vrot.lane.b32.xlu0 %v884_v48, %s2213_s22 }
 0x17a   : > { %v2660_v4 = vpop.permute.xlu1 %971  ;;  %v914_v6 = vpop.permute.xlu0 %913 }
 0x17b   : > { %v1076_v30 = vsel %vm1055_vm4, %v720_v49, %v914_v6 }
 0x17c   : > { %1483 = vrot.lane.b32.xlu0 %v2204_v3, %s2208_s24 }
 0x17e   : > { %v2664_v46 = vpop.permute.xlu1 %1024  ;;  %v2666_v14 = vpop.permute.xlu0 %969 }
 0x180   : > { %1500 = vrot.lane.b32.xlu0 %v2362_v18, %s2210_s17 }
 0x182   : > { %v2670_v12 = vpop.permute.xlu1 %1028  ;;  %v2672_v24 = vpop.permute.xlu0 %1026 }
 0x186   : > { %v976_v53 = vpop.permute.xlu1 %975  ;;  %v974_v19 = vpop.permute.xlu0 %973 }
 0x18a   : > { %v904_v21 = vpop.permute.xlu1 %903  ;;  %v1031_v51 = vpop.permute.xlu0 %1030 }
 0x18b   : > { %v2678_v23 = vsel %vm1055_vm4, %v715_v22, %v904_v21 }
 0x18e   : > { %v916_v20 = vpop.permute.xlu1 %915  ;;  %v906_v28 = vpop.permute.xlu0 %905 }
 0x18f   : > { %v2687_v32 = vsel %vm1055_vm4, %v721_v31, %v916_v20  ;;  %v1064_v1 = vsel %vm1055_vm4, %v716_v16, %v906_v28 }
 0x192   : > { %v932_v0 = vpop.permute.xlu1 %931  ;;  %v934_v26 = vpop.permute.xlu0 %933 }
 0x193   : > { %v1088_v27 = vsel %vm1080_vm6, %v1067_v59, %v932_v0  ;;  %v1090_v29 = vsel %vm1080_vm6, %v1070_v25, %v934_v26  ;;  %v650_v59 = vrot.slane %v2204_v3, 7 }
 0x196   : > { %v936_v33 = vpop.permute.xlu1 %935  ;;  %v938_v34 = vpop.permute.xlu0 %937 }
 0x197   : > { %v1092_v38 = vsel %vm1080_vm6, %v1073_v54, %v936_v33  ;;  %v2710_v40 = vsel %vm1080_vm6, %v1076_v30, %v938_v34 }
 0x19a   : > { %v968_v9 = vpop.permute.xlu1 %967  ;;  %v2712_v41 = vpop.permute.xlu0 %965 }
 0x19e   : > { %v2714_v43 = vpop.permute.xlu1 %979  ;;  %v2716_v52 = vpop.permute.xlu0 %1022 }
 0x1a2   : > { %v2718_v44 = vpop.permute.xlu1 %1032  ;;  %v2720_v56 = vpop.permute.xlu0 %977 }
 0x1a6   : > { %v956_v45 = vpop.permute.xlu1 %955  ;;  %v2722_v36 = vpop.permute.xlu0 %1034 }
 0x1a7   : > { %v1105_v25 = vsel %vm1097_vm7, %v1088_v27, %v956_v45 }
 0x1a8   : > { %v1122_v26 = vsel %vm1114_vm8, %v1105_v25, %v2660_v4 }
 0x1aa   : > { %v996_v60 = vpop.permute.xlu1 %995  ;;  %v954_v47 = vpop.permute.xlu0 %953 }
 0x1ab   : > { %v1139_v57 = vsel %vm1131_vm9, %v1122_v26, %v996_v60 }
 0x1ae   : > { %v1009_v48 = vpop.permute.xlu1 %1008  ;;  %v994_v50 = vpop.permute.xlu0 %993 }
 0x1b2   : > { %v1013_v61 = vpop.permute.xlu1 %1012  ;;  %v1011_v62 = vpop.permute.xlu0 %1010 }
 0x1b3   : > { %v1156_v49 = vsel %vm1148_vm10, %v1139_v57, %v1013_v61 }
 0x1b4   : > { %v1173_v45 = vsel %vm1165_vm11, %v1156_v49, %v2670_v12 }
 0x1b6   : > { %v2724_v2 = vpop.permute.xlu1 %1041  ;;  %v1044_v15 = vpop.permute.xlu0 %1043 }
 0x1ba   : > { %v1046_v63 = vpop.permute.xlu1 %1045  ;;  %v958_v5 = vpop.permute.xlu0 %957 }
 0x1bb   : > { %v1107_v8 = vsel %vm1097_vm7, %v1090_v29, %v958_v5  ;;  %v1190_v60 = vsel %vm1182_vm12, %v1173_v45, %v1046_v63 }
 0x1bc   : > { %v1124_v21 = vsel %vm1114_vm8, %v1107_v8, %v974_v19  ;;  %v2737_v19 = vsel %vm2339_vm2, 0, %v650_v59 }
 0x1bd   : > { %v1058_v54 = vsel %vm1055_vm4, %v2737_v19, %v2379_v35  ;;  %1567 = vrot.lane.b32.xlu1 %v2737_v19, %s2214_s30 }
 0x1be   : > { %v960_v7 = vpop.permute.xlu1 %959  ;;  %v998_v10 = vpop.permute.xlu0 %997  ;;  %v1082_v35 = vsel %vm1080_vm6, %v1058_v54, %v2386_v39 }
 0x1bf   : > { %v1109_v13 = vsel %vm1097_vm7, %v1092_v38, %v960_v7  ;;  %v1141_v22 = vsel %vm1131_vm9, %v1124_v21, %v998_v10 }
 0x1c0   : > { %v1126_v6 = vsel %vm1114_vm8, %v1109_v13, %v976_v53 }
 0x1c2   : > { %v1000_v20 = vpop.permute.xlu1 %999  ;;  %v1015_v31 = vpop.permute.xlu0 %1014 }
 0x1c3   : > { %v1158_v16 = vsel %vm1148_vm10, %v1141_v22, %v1015_v31 }
 0x1c4   : > { %v1175_v28 = vsel %vm1165_vm11, %v1158_v16, %v1031_v51 }
 0x1c6   : > { %v928_v58 = vpop.permute.xlu1 %927  ;;  %v1048_v55 = vpop.permute.xlu0 %1047 }
 0x1c7   : > { %v1084_v30 = vsel %vm1080_vm6, %v2678_v23, %v928_v58  ;;  %v1143_v58 = vsel %vm1131_vm9, %v1126_v6, %v1000_v20  ;;  %v1192_v6 = vsel %vm1182_vm12, %v1175_v28, %v1048_v55 }
 0x1ca   : > { %v940_v53 = vpop.permute.xlu1 %939  ;;  %v930_v0 = vpop.permute.xlu0 %929 }
 0x1cb   : > { %v1086_v29 = vsel %vm1080_vm6, %v1064_v1, %v930_v0  ;;  %v1096_v39 = vsel %vm1080_vm6, %v2687_v32, %v940_v53 }
 0x1cc   : > { %v1103_v51 = vsel %vm1097_vm7, %v1086_v29, %v954_v47 }
 0x1cd   : > { %v1120_v27 = vsel %vm1114_vm8, %v1103_v51, %v2666_v14 }
 0x1ce   : > { %v1137_v4 = vsel %vm1131_vm9, %v1120_v27, %v994_v50  ;;  %v952_v1 = vpop.permute.xlu1 %951  ;;  %v950_v33 = vpop.permute.xlu0 %949 }
 0x1cf   : > { %v1154_v34 = vsel %vm1148_vm10, %v1137_v4, %v1011_v62  ;;  %v1101_v38 = vsel %vm1097_vm7, %v1084_v30, %v952_v1  ;;  %v1099_v47 = vsel %vm1097_vm7, %v1082_v35, %v950_v33  ;;  %v2822_v1 = vld [vmem:[%s3085_s5] ss:$0 sm:$0xff] }
 0x1d0   : > { %v1171_v14 = vsel %vm1165_vm11, %v1154_v34, %v2672_v24  ;;  %v1118_v50 = vsel %vm1114_vm8, %v1101_v38, %v968_v9  ;;  %v1116_v24 = vsel %vm1114_vm8, %v1099_v47, %v2712_v41 }
 0x1d1   : > { %v1188_v23 = vsel %vm1182_vm12, %v1171_v14, %v1044_v15 }
 0x1d2   : > { %v992_v61 = vpop.permute.xlu1 %991  ;;  %v990_v62 = vpop.permute.xlu0 %989  ;;  %v2012_v5 = vcombine.low %v1188_v23, %v1190_v60 }
 0x1d3   : > { %v1135_v8 = vsel %vm1131_vm9, %v1118_v50, %v992_v61  ;;  %v1133_v63 = vsel %vm1131_vm9, %v1116_v24, %v990_v62 }
 0x1d4   : > { %v1152_v12 = vsel %vm1148_vm10, %v1135_v8, %v1009_v48 }
 0x1d5   : > { %v1169_v48 = vsel %vm1165_vm11, %v1152_v12, %v2664_v46 }
 0x1d6   : > { %v964_v15 = vpop.permute.xlu1 %963  ;;  %v1007_v7 = vpop.permute.xlu0 %1006  ;;  %v1186_v31 = vsel %vm1182_vm12, %v1169_v48, %v2724_v2 }
 0x1d7   : > { %v1113_v10 = vsel %vm1097_vm7, %v1096_v39, %v964_v15  ;;  %v1150_v9 = vsel %vm1148_vm10, %v1133_v63, %v1007_v7 }
 0x1d8   : > { %v1130_v13 = vsel %vm1114_vm8, %v1113_v10, %v2714_v43  ;;  %v1167_v41 = vsel %vm1165_vm11, %v1150_v9, %v2716_v52 }
 0x1da   : > { %v1004_v21 = vpop.permute.xlu1 %1003  ;;  %v1040_v22 = vpop.permute.xlu0 %1039 }
 0x1db   : > { %v1184_v32 = vsel %vm1182_vm12, %v1167_v41, %v1040_v22  ;;  %v1147_v26 = vsel %vm1131_vm9, %v1130_v13, %v1004_v21 }
 0x1dc   : > { %v2011_v16 = vcombine.low %v1184_v32, %v1186_v31 }
 0x1de   : > { %v1017_v59 = vpop.permute.xlu1 %1016  ;;  %2067 = vmatprep.mubr.msk.bf16.mxu0 %vm1239_vm13, %v2011_v16  ;;  %v962_v43 = vpop.permute.xlu0 %961 }
 0x1df   : > { %v1160_v46 = vsel %vm1148_vm10, %v1143_v58, %v1017_v59  ;;  %v1111_v25 = vsel %vm1097_vm7, %v2710_v40, %v962_v43  ;;  %2068 = vmatmul.mubr.msk.bf16.vlgmr.msra.gmra.mxu0 %vm1239_vm13, %v2012_v5 }
 0x1e0   : > { %v1128_v52 = vsel %vm1114_vm8, %v1111_v25, %v2720_v56  ;;  %v1177_v2 = vsel %vm1165_vm11, %v1160_v46, %v2718_v44  ;;  %v1164_v56 = vsel %vm1148_vm10, %v1147_v26, %v2383_v37  ;;  %v2811_v37 = vstv %s2024_s10 }
 0x1e1   : > { %v1181_v55 = vsel %vm1165_vm11, %v1164_v56, %v2390_v42  ;;  %v2817_v42 = vld [vmem:[%s3084_s4] ss:$0 sm:$0xff]  ;;  %v1354_v34 = vadd.s32 2, %v2811_v37  ;;  %v1357_v21 = vadd.s32 5, %v2811_v37  ;;  %v1355_v59 = vadd.s32 3, %v2811_v37 }
 0x1e2   : > { %v1050_v53 = vpop.permute.xlu1 %1049  ;;  %v1002_v0 = vpop.permute.xlu0 %1001  ;;  %v2218_v56 = vmov 0.0  }
 0x1e3   : > { %v1194_v20 = vsel %vm1182_vm12, %v1177_v2, %v1050_v53  ;;  %v1145_v40 = vsel %vm1131_vm9, %v1128_v52, %v1002_v0  ;;  %vm1360_vm1 = vcmp.ge.s32.totalorder %v1354_v34, 0  ;;  %vm1366_vm4 = vcmp.lt.s32.totalorder %v1354_v34, 8  ;;  %2075 = vmatprep.subr.bf16.mxu1 %v2218_v56 }
 0x1e4   : > { %v2013_v29 = vcombine.low %v1192_v6, %v1194_v20  ;;  %vm1372_vm7 = vmand %vm1360_vm1, %vm1366_vm4  ;;  %vm1358_vm9 = vcmp.ge.s32.totalorder %v2811_v37, 0  ;;  %vm1361_vm1 = vcmp.ge.s32.totalorder %v1355_v59, 0  ;;  %vm1367_vm4 = vcmp.lt.s32.totalorder %v1355_v59, 8 }
 0x1e6   : > { %2071 = vmatprep.mubr.msk.bf16.mxu0 %vm1239_vm13, %v2013_v29  ;;  %v1019_v57 = vpop.permute.xlu0 %1018  ;;  %v1054_v51 = vpop.permute.xlu1 %1053 }
 0x1e7   : > { %v1162_v44 = vsel %vm1148_vm10, %v1145_v40, %v1019_v57  ;;  %v1198_v27 = vsel %vm1182_vm12, %v1181_v55, %v1054_v51  ;;  %v2158_v57 = vld [vmem:[%s3086_s6 + $0x20] ss:$0 sps:$4 sm:$0xff]  }
 0x1e8   : > { %v1179_v28 = vsel %vm1165_vm11, %v1162_v44, %v2722_v36  ;;  %v1353_v36 = vadd.s32 1, %v2811_v37  ;;  %vm1364_vm11 = vcmp.lt.s32.totalorder %v2811_v37, 8  ;;  %v1761_v44 = vsel %vm746_vm3, %v2158_v57, 0 }
 0x1e9   : > { %2076 = vmatpush3.bf16.msra.mxu1 %v1761_v44 }
 0x1ea   : > { %v1052_v49 = vpop.permute.xlu0 %1051  ;;  %vm1359_vm14 = vcmp.ge.s32.totalorder %v1353_v36, 0  ;;  %vm1365_vm15 = vcmp.lt.s32.totalorder %v1353_v36, 8  ;;  %2077 = vmatprep.subr.bf16.mxu1 %v2218_v56 }
 0x1eb   : > { %v1196_v54 = vsel %vm1182_vm12, %v1179_v28, %v1052_v49  ;;  %vm1371_vm0 = vmand %vm1359_vm14, %vm1365_vm15  ;;  %vm1363_vm14 = vcmp.ge.s32.totalorder %v1357_v21, 0  ;;  %vm1369_vm15 = vcmp.lt.s32.totalorder %v1357_v21, 8  ;;  %v2159_v49 = vld [vmem:[%s3086_s6 + $0x18] sm:$0xff]  }
 0x1ec   : > { %v2014_v30 = vcombine.low %v1196_v54, %v1198_v27 }
 0x1ed   : > { %2078 = vmatpush3.bf16.msra.mxu1 %v2159_v49 }
 0x1ee   : > { %2072 = vmatmul.mubr.msk.bf16.gmra.mxu0 %vm1239_vm13, %v2014_v30  ;;  %vm1370_vm13 = vmand %vm1358_vm9, %vm1364_vm11  ;;  %2079 = vmatprep.subr.bf16.mxu1 %v2218_v56  ;;  %v1484_v11 = vpop.permute.xlu0 %1483 }
 0x22f   : > { %v2981_v17 = vpop.permute.xlu1 %1567 }
 0x29f   : > { %v2069_v4 = vpop.f32.mrf.mxu0 }
 0x2a0   : > { %v1327_v33 = vmul.f32 %v2069_v4, %v2817_v42 }
 0x2a1   : > { %v1290_v38 = vpop.f32.mrf.mxu0 }
 0x2a2   : > { %v1340_v45 = vadd.f32 %v2822_v1, %v1327_v33  ;;  %v1356_v33 = vadd.s32 4, %v2811_v37  ;;  %v2161_v37 = vld [vmem:[%s3086_s6 + $0x8] sm:$0xff]  }
 0x2a3   : > { %v2070_v14 = vpop.f32.mrf.mxu0 }
 0x2a4   : > { %v1346_v35 = vmax.f32 %v1340_v45, 0.0  ;;  %v1328_v60 = vmul.f32 %v2070_v14, %v2817_v42  ;;  %v2160_v14 = vld [vmem:[%s3086_s6 + $0x10] sm:$0xff]   ;;  %vm1362_vm3 = vcmp.ge.s32.totalorder %v1356_v33, 0  ;;  %vm1368_vm9 = vcmp.lt.s32.totalorder %v1356_v33, 8 }
 0x2a5   : > { %v1292_v23 = vpop.f32.mrf.mxu0  ;;  %2080 = vmatpush3.bf16.msra.mxu1 %v2160_v14  ;;  %vm1374_vm11 = vmand %vm1362_vm3, %vm1368_vm9 }
 0x2a6   : > { %v1389_v47 = vsel %vm1371_vm0, %v1346_v35, 0.0  ;;  %v1341_v50 = vadd.f32 %v2822_v1, %v1328_v60  ;;  %v1326_v61 = vmul.f32 %v2817_v42, %v1292_v23  ;;  %vm1375_vm0 = vmand %vm1363_vm14, %vm1369_vm15  ;;  %2081 = vmatprep.subr.bf16.mxu1 %v2218_v56  ;;  %v2162_v23 = vld [vmem:[%s3086_s6] sm:$0xff]   ;;  %vm1672_vm14 = vcmask 457728  }
 0x2a7   : > { %v1395_v62 = vpack.c.bf16 %v1389_v47, %v1389_v47  ;;  %vm1685_vm15 = vcmask 523264  }
 0x2a8   : > { %v1347_v5 = vmax.f32 %v1341_v50, 0.0  ;;  %v1339_v8 = vadd.f32 %v2822_v1, %v1326_v61 }
 0x2a9   : > { %1569 = vrot.lane.b32.xlu0 %v1395_v62, %s2215_s16  ;;  %1533 = vrot.lane.b32.xlu1 %v1395_v62, %s2213_s22  ;;  %v1408_v63 = vshrl.u32 %v1395_v62, 16  ;;  %v1411_v48 = vshll.u32 %v1395_v62, 16 }
 0x2aa   : > { %v1390_v12 = vsel %vm1372_vm7, %v1347_v5, 0.0  ;;  %v1345_v39 = vmax.f32 %v1339_v8, 0.0  ;;  %vm1373_vm7 = vmand %vm1361_vm1, %vm1367_vm4  ;;  %2082 = vmatpush3.bf16.msra.mxu1 %v2161_v37 }
 0x2ab   : > { %v2835_v24 = vpack.c.bf16 %v1390_v12, %v1390_v12  ;;  %v1410_v13 = vrot.slane %v1408_v63, 7  ;;  %v1447_v58 = vrot.slane %v1411_v48, 1  ;;  %2083 = vmatprep.subr.bf16.mxu1 %v2218_v56 }
 0x2ac   : > { %v1388_v7 = vsel %vm1370_vm13, %v1345_v39, 0.0  ;;  %vm2219_vm13 = vmmov 0  }
 0x2ad   : > { %1487 = vrot.lane.b32.xlu0 %v1395_v62, %s2208_s24  ;;  %1571 = vrot.lane.b32.xlu1 %v2835_v24, %s2215_s16  ;;  %v2846_v22 = vpack.c.bf16 %v1388_v7, %v1388_v7  ;;  %v1413_v16 = vor.u32 %v1411_v48, %v1410_v13  ;;  %v1448_v52 = vor.u32 %v1447_v58, %v1408_v63  ;;  %v1415_v6 = vshrl.u32 %v2835_v24, 16 }
 0x2ae   : > { %v2073_v15 = vpop.f32.mrf.mxu0  ;;  %v1418_v40 = vshll.u32 %v2835_v24, 16  ;;  %2085 = vmatprep.mubr.msk.bf16.mxu1 %vm2219_vm13, %v2218_v56  ;;  %2084 = vmatpush3.bf16.msra.mxu1 %v2162_v23 }
 0x2af   : > { %v1331_v10 = vmul.f32 %v2073_v15, %v2817_v42  ;;  %v2858_v25 = vsel %vm2339_vm2, 0, %v1413_v16  ;;  %v1461_v0 = vsel %vm2354_vm5, %v1448_v52, 0  ;;  %v1417_v29 = vrot.slane %v1415_v6, 7 }
 0x2b0   : > { %v1305_v9 = vpop.f32.mrf.mxu0  ;;  %v1449_v55 = vrot.slane %v1418_v40, 1  ;;  %v1404_v4 = vshll.u32 %v2846_v22, 16  ;;  %v1401_v38 = vshrl.u32 %v2846_v22, 16 }
 0x2b1   : > { %1535 = vrot.lane.b32.xlu0 %v2835_v24, %s2213_s22  ;;  %1489 = vrot.lane.b32.xlu1 %v2835_v24, %s2208_s24  ;;  %v1344_v32 = vadd.f32 %v2822_v1, %v1331_v10  ;;  %v1329_v31 = vmul.f32 %v2817_v42, %v1305_v9  ;;  %v1420_v28 = vor.u32 %v1418_v40, %v1417_v29 }
 0x2b2   : > { %v2074_v41 = vpop.f32.mrf.mxu0  ;;  %v1450_v36 = vor.u32 %v1449_v55, %v1415_v6  ;;  %v1445_v45 = vrot.slane %v1404_v4, 1  ;;  %v1403_v60 = vrot.slane %v1401_v38, 7 }
 0x2b3   : > { %v1350_v43 = vmax.f32 %v1344_v32, 0.0  ;;  %v1342_v46 = vadd.f32 %v2822_v1, %v1329_v31  ;;  %v2893_v30 = vsel %vm2339_vm2, 0, %v1420_v28 }
 0x2b4   : > { %v1308_v27 = vpop.f32.mrf.mxu0  ;;  %v1446_v35 = vor.u32 %v1445_v45, %v1401_v38  ;;  %v1406_v61 = vor.u32 %v1404_v4, %v1403_v60 }
 0x2b5   : > { %1531 = vrot.lane.b32.xlu0 %v2846_v22, %s2213_s22  ;;  %1485 = vrot.lane.b32.xlu1 %v2846_v22, %s2208_s24  ;;  %v1393_v2 = vsel %vm1375_vm0, %v1350_v43, 0.0  ;;  %v1348_v53 = vmax.f32 %v1342_v46, 0.0  ;;  %v1330_v54 = vmul.f32 %v2817_v42, %v1308_v27  ;;  %v1462_v42 = vsel %vm2354_vm5, %v1450_v36, 0 }
 0x2b6   : > { %v2869_v20 = vpack.c.bf16 %v1393_v2, %v1393_v2  ;;  %v1460_v50 = vsel %vm2354_vm5, %v1446_v35, 0  ;;  %v2932_v8 = vsel %vm2339_vm2, 0, %v1406_v61  ;;  %vm1749_vm0 = vcmask 588800  }
 0x2b7   : > { %v1391_v26 = vsel %vm1373_vm7, %v1348_v53, 0.0  ;;  %v1343_v34 = vadd.f32 %v2822_v1, %v1330_v54 }
 0x2b8   : > { %v2880_v51 = vpack.c.bf16 %v1391_v26, %v1391_v26  ;;  %v1466_v62 = vshrl.u32 %v2869_v20, 16  ;;  %v1469_v24 = vshll.u32 %v2869_v20, 16 }
 0x2b9   : > { %1557 = vrot.lane.b32.xlu0 %v2858_v25, %s2214_s30  ;;  %1520 = vrot.lane.b32.xlu1 %v2858_v25, %s2205_s18  ;;  %v1349_v1 = vmax.f32 %v1343_v34, 0.0 }
 0x2ba   : > { %v1468_v12 = vrot.slane %v1466_v62, 7  ;;  %v1474_v63 = vrot.slane %v1469_v24, 1  ;;  %v1422_v15 = vshrl.u32 %v2880_v51, 16  ;;  %v1425_v13 = vshll.u32 %v2880_v51, 16 }
 0x2bb   : > { %v1392_v47 = vsel %vm1374_vm11, %v1349_v1, 0.0 }
 0x2bc   : > { %v1398_v5 = vpack.c.bf16 %v1392_v47, %v1392_v47  ;;  %v1471_v39 = vor.u32 %v1469_v24, %v1468_v12  ;;  %v1475_v10 = vor.u32 %v1474_v63, %v1466_v62  ;;  %v1424_v9 = vrot.slane %v1422_v15, 7 }
 0x2bd   : > { %1581 = vrot.lane.b32.xlu0 %v1461_v0, %s2216_s26  ;;  %1546 = vrot.lane.b32.xlu1 %v1461_v0, %s2217_s27  ;;  %v1451_v41 = vrot.slane %v1425_v13, 1 }
 0x2be   : > { %v1473_v7 = vsel %vm2339_vm2, 0, %v1471_v39  ;;  %v1477_v48 = vsel %vm2354_vm5, %v1475_v10, 0  ;;  %v1427_v21 = vor.u32 %v1425_v13, %v1424_v9  ;;  %v1429_v22 = vshrl.u32 %v1398_v5, 16 }
 0x2bf   : > { %v1452_v31 = vor.u32 %v1451_v41, %v1422_v15  ;;  %v1432_v58 = vshll.u32 %v1398_v5, 16 }
 0x2c0   : > { %v2952_v32 = vsel %vm2339_vm2, 0, %v1427_v21  ;;  %v1431_v16 = vrot.slane %v1429_v22, 7 }
 0x2c1   : > { %1504 = vrot.lane.b32.xlu0 %v1461_v0, %s2210_s17  ;;  %1541 = vrot.lane.b32.xlu1 %v2869_v20, %s2213_s22  ;;  %v1463_v59 = vsel %vm2354_vm5, %v1452_v31, 0  ;;  %v1453_v46 = vrot.slane %v1432_v58, 1  ;;  %v1501_v0 = vpop.permute.xlu0 %1500 }
 0x2c2   : > { %v1434_v43 = vor.u32 %v1432_v58, %v1431_v16 }
 0x2c3   : > { %v1454_v2 = vor.u32 %v1453_v46, %v1429_v22 }
 0x2c4   : > { %v2964_v52 = vsel %vm2339_vm2, 0, %v1434_v43  ;;  %vm1646_vm2 = vcmask 326656  }
 0x2c5   : > { %1577 = vrot.lane.b32.xlu0 %v2869_v20, %s2215_s16  ;;  %1537 = vrot.lane.b32.xlu1 %v2880_v51, %s2213_s22  ;;  %v1464_v53 = vsel %vm2354_vm5, %v1454_v2, 0  ;;  %vm1659_vm5 = vcmask 392192  }
 0x2c9   : > { %1573 = vrot.lane.b32.xlu0 %v2880_v51, %s2215_s16  ;;  %1559 = vrot.lane.b32.xlu1 %v2893_v30, %s2214_s30 }
 0x2cd   : > { %1491 = vrot.lane.b32.xlu0 %v2880_v51, %s2208_s24  ;;  %1583 = vrot.lane.b32.xlu1 %v1462_v42, %s2216_s26 }
 0x2d1   : > { %1522 = vrot.lane.b32.xlu0 %v2893_v30, %s2205_s18  ;;  %1506 = vrot.lane.b32.xlu1 %v1462_v42, %s2210_s17 }
 0x2d5   : > { %1548 = vrot.lane.b32.xlu0 %v1462_v42, %s2217_s27  ;;  %1502 = vrot.lane.b32.xlu1 %v1460_v50, %s2210_s17 }
 0x2d9   : > { %1518 = vrot.lane.b32.xlu0 %v2932_v8, %s2205_s18  ;;  %1575 = vrot.lane.b32.xlu1 %v1398_v5, %s2215_s16 }
 0x2dd   : > { %1544 = vrot.lane.b32.xlu0 %v1460_v50, %s2217_s27  ;;  %1493 = vrot.lane.b32.xlu1 %v1398_v5, %s2208_s24  ;;  %v1594_v50 = vsel %vm1080_vm6, %v2737_v19, %v1484_v11 }
 0x2e1   : > { %1539 = vrot.lane.b32.xlu0 %v1398_v5, %s2213_s22  ;;  %1528 = vrot.lane.b32.xlu1 %v1473_v7, %s2205_s18  ;;  %v1611_v5 = vsel %vm1114_vm8, %v1594_v50, %v1501_v0 }
 0x2e5   : > { %1565 = vrot.lane.b32.xlu0 %v1473_v7, %s2214_s30  ;;  %1554 = vrot.lane.b32.xlu1 %v1477_v48, %s2217_s27 }
 0x2e9   : > { %1561 = vrot.lane.b32.xlu0 %v2952_v32, %s2214_s30  ;;  %1524 = vrot.lane.b32.xlu1 %v2952_v32, %s2205_s18 }
 0x2ed   : > { %1585 = vrot.lane.b32.xlu0 %v1463_v59, %s2216_s26  ;;  %1550 = vrot.lane.b32.xlu1 %v1463_v59, %s2217_s27 }
 0x2f1   : > { %1508 = vrot.lane.b32.xlu0 %v1463_v59, %s2210_s17  ;;  %1563 = vrot.lane.b32.xlu1 %v2964_v52, %s2214_s30  ;;  %s1999_s30 = sshll.u32 %s2310_s19, 3 }
 0x2f5   : > { %1526 = vrot.lane.b32.xlu0 %v2964_v52, %s2205_s18  ;;  %1587 = vrot.lane.b32.xlu1 %v1464_v53, %s2216_s26 }
 0x2f9   : > { %1552 = vrot.lane.b32.xlu0 %v1464_v53, %s2217_s27  ;;  %1510 = vrot.lane.b32.xlu1 %v1464_v53, %s2210_s17  ;;  %s498_s27 = scalar_lea.vmem %s3089_s9, %s1999_s30 }
 0x2fd   : > { %1589 = vrot.lane.b32.xlu0 %v1477_v48, %s2216_s26  ;;  %1579 = vrot.lane.b32.xlu1 %v2204_v3, %s2215_s16 }
 0x301   : > { %1591 = vrot.lane.b32.xlu1 %v2362_v18, %s2216_s26 }
 0x31b   : > { %v1534_v6 = vpop.permute.xlu1 %1533  ;;  %v1570_v20 = vpop.permute.xlu0 %1569 }
 0x31f   : > { %v1572_v26 = vpop.permute.xlu1 %1571  ;;  %v1488_v29 = vpop.permute.xlu0 %1487 }
 0x320   : > { %v1600_v38 = vsel %vm1080_vm6, %v2858_v25, %v1488_v29 }
 0x323   : > { %v1490_v40 = vpop.permute.xlu1 %1489  ;;  %v1536_v57 = vpop.permute.xlu0 %1535 }
 0x324   : > { %v1603_v2 = vsel %vm1080_vm6, %v2893_v30, %v1490_v40 }
 0x327   : > { %v1486_v44 = vpop.permute.xlu1 %1485  ;;  %v1532_v51 = vpop.permute.xlu0 %1531 }
 0x328   : > { %v1597_v60 = vsel %vm1080_vm6, %v2932_v8, %v1486_v44 }
 0x32b   : > { %v1521_v28 = vpop.permute.xlu1 %1520  ;;  %v1558_v55 = vpop.permute.xlu0 %1557 }
 0x32f   : > { %v1547_v49 = vpop.permute.xlu1 %1546  ;;  %v1582_v27 = vpop.permute.xlu0 %1581 }
 0x333   : > { %v2983_v3 = vpop.permute.xlu1 %1541  ;;  %v1505_v54 = vpop.permute.xlu0 %1504 }
 0x334   : > { %v1615_v45 = vsel %vm1114_vm8, %v1600_v38, %v1505_v54 }
 0x337   : > { %v1538_v18 = vpop.permute.xlu1 %1537  ;;  %v2985_v36 = vpop.permute.xlu0 %1577 }
 0x33b   : > { %v1560_v4 = vpop.permute.xlu1 %1559  ;;  %v1574_v33 = vpop.permute.xlu0 %1573 }
 0x33f   : > { %v1584_v34 = vpop.permute.xlu1 %1583  ;;  %v1492_v42 = vpop.permute.xlu0 %1491 }
 0x340   : > { %v1606_v30 = vsel %vm1080_vm6, %v2952_v32, %v1492_v42 }
 0x343   : > { %v1507_v14 = vpop.permute.xlu1 %1506  ;;  %v1523_v37 = vpop.permute.xlu0 %1522 }
 0x344   : > { %v1627_v1 = vsel %vm1148_vm10, %v1615_v45, %v1523_v37  ;;  %v1617_v53 = vsel %vm1114_vm8, %v1603_v2, %v1507_v14 }
 0x345   : > { %v1639_v35 = vsel %vm1182_vm12, %v1627_v1, %v1536_v57 }
 0x347   : > { %v1503_v23 = vpop.permute.xlu1 %1502  ;;  %v1549_v47 = vpop.permute.xlu0 %1548 }
 0x348   : > { %v1613_v61 = vsel %vm1114_vm8, %v1597_v60, %v1503_v23 }
 0x349   : > { %v1625_v25 = vsel %vm1148_vm10, %v1613_v61, %v1521_v28 }
 0x34a   : > { %v1637_v62 = vsel %vm1182_vm12, %v1625_v25, %v1534_v6 }
 0x34b   : > { %v1650_v12 = vsel %vm1646_vm2, %v1637_v62, %v1547_v49  ;;  %v1576_v24 = vpop.permute.xlu1 %1575  ;;  %v1519_v39 = vpop.permute.xlu0 %1518 }
 0x34c   : > { %v1623_v8 = vsel %vm1148_vm10, %v1611_v5, %v1519_v39  ;;  %v1663_v63 = vsel %vm1659_vm5, %v1650_v12, %v1560_v4 }
 0x34d   : > { %v1635_v15 = vsel %vm1182_vm12, %v1623_v8, %v1532_v51  ;;  %v1676_v9 = vsel %vm1672_vm14, %v1663_v63, %v1572_v26  ;;  %v1652_v26 = vsel %vm1646_vm2, %v1639_v35, %v1549_v47 }
 0x34e   : > { %v1689_v31 = vsel %vm1685_vm15, %v1676_v9, %v1584_v34 }
 0x34f   : > { %v1494_v19 = vpop.permute.xlu1 %1493  ;;  %v1545_v7 = vpop.permute.xlu0 %1544 }
 0x350   : > { %v1648_v10 = vsel %vm1646_vm2, %v1635_v15, %v1545_v7  ;;  %v1609_v45 = vsel %vm1080_vm6, %v2964_v52, %v1494_v19 }
 0x351   : > { %v1661_v13 = vsel %vm1659_vm5, %v1648_v10, %v1558_v55 }
 0x352   : > { %v1674_v48 = vsel %vm1672_vm14, %v1661_v13, %v1570_v20 }
 0x353   : > { %v1529_v21 = vpop.permute.xlu1 %1528  ;;  %v1540_v41 = vpop.permute.xlu0 %1539  ;;  %v1687_v22 = vsel %vm1685_vm15, %v1674_v48, %v1582_v27 }
 0x354   : > { %v2025_v16 = vcombine.low %v1687_v22, %v1689_v31 }
 0x356   : > { %2086 = vmatmul.mubr.msk.bf16.vlgmr.msra.gmra.mxu1 %vm1749_vm0, %v2025_v16 }
 0x357   : > { %v1555_v58 = vpop.permute.xlu1 %1554  ;;  %v1566_v59 = vpop.permute.xlu0 %1565  ;;  %2089 = vmatprep.mubr.msk.bf16.mxu1 %vm2219_vm13, %v2218_v56 }
 0x35b   : > { %v1525_v43 = vpop.permute.xlu1 %1524  ;;  %v1562_v46 = vpop.permute.xlu0 %1561 }
 0x35c   : > { %v1629_v11 = vsel %vm1148_vm10, %v1617_v53, %v1525_v43  ;;  %v1665_v51 = vsel %vm1659_vm5, %v1652_v26, %v1562_v46 }
 0x35d   : > { %v1641_v20 = vsel %vm1182_vm12, %v1629_v11, %v1538_v18  ;;  %v1678_v40 = vsel %vm1672_vm14, %v1665_v51, %v1574_v33 }
 0x35f   : > { %v1551_v0 = vpop.permute.xlu1 %1550  ;;  %v1586_v6 = vpop.permute.xlu0 %1585 }
 0x360   : > { %v1654_v29 = vsel %vm1646_vm2, %v1641_v20, %v1551_v0  ;;  %v1691_v18 = vsel %vm1685_vm15, %v1678_v40, %v1586_v6 }
 0x363   : > { %v1564_v57 = vpop.permute.xlu1 %1563  ;;  %v1509_v44 = vpop.permute.xlu0 %1508 }
 0x364   : > { %v1667_v28 = vsel %vm1659_vm5, %v1654_v29, %v1564_v57  ;;  %v1619_v55 = vsel %vm1114_vm8, %v1606_v30, %v1509_v44 }
 0x365   : > { %v1680_v49 = vsel %vm1672_vm14, %v1667_v28, %v1576_v24 }
 0x367   : > { %v1588_v27 = vpop.permute.xlu1 %1587  ;;  %v1527_v54 = vpop.permute.xlu0 %1526 }
 0x368   : > { %v1693_v4 = vsel %vm1685_vm15, %v1680_v49, %v1588_v27  ;;  %v1631_v34 = vsel %vm1148_vm10, %v1619_v55, %v1527_v54 }
 0x369   : > { %v2026_v38 = vcombine.low %v1691_v18, %v1693_v4  ;;  %v1643_v32 = vsel %vm1182_vm12, %v1631_v34, %v1540_v41 }
 0x36b   : > { %v1511_v14 = vpop.permute.xlu1 %1510  ;;  %2090 = vmatmul.mubr.msk.bf16.gmra.mxu1 %vm1749_vm0, %v2026_v38  ;;  %v1553_v33 = vpop.permute.xlu0 %1552 }
 0x36c   : > { %v1621_v42 = vsel %vm1114_vm8, %v1609_v45, %v1511_v14  ;;  %v1656_v37 = vsel %vm1646_vm2, %v1643_v32, %v1553_v33  ;;  %2093 = vmatprep.mubr.msk.bf16.mxu1 %vm2219_vm13, %v2218_v56 }
 0x36d   : > { %v1633_v1 = vsel %vm1148_vm10, %v1621_v42, %v1529_v21  ;;  %v1669_v52 = vsel %vm1659_vm5, %v1656_v37, %v1566_v59 }
 0x36e   : > { %v1645_v35 = vsel %vm1182_vm12, %v1633_v1, %v2983_v3  ;;  %v1682_v50 = vsel %vm1672_vm14, %v1669_v52, %v2985_v36  ;;  %v2037_v36 = vld [vmem:[%s3088_s8] ss:$0 sm:$0xff] }
 0x36f   : > { %v1580_v60 = vpop.permute.xlu1 %1579  ;;  %v1658_v23 = vsel %vm1646_vm2, %v1645_v35, %v1555_v58  ;;  %v1590_v61 = vpop.permute.xlu0 %1589 }
 0x370   : > { %v1671_v47 = vsel %vm1659_vm5, %v1658_v23, %v2981_v17  ;;  %v1695_v62 = vsel %vm1685_vm15, %v1682_v50, %v1590_v61  ;;  %v2036_v17 = vld [vmem:[%s3087_s7] ss:$0 sm:$0xff] }
 0x371   : > { %v1684_v56 = vsel %vm1672_vm14, %v1671_v47, %v1580_v60 }
 0x373   : > { %v1592_v25 = vpop.permute.xlu1 %1591 }
 0x374   : > { %v1697_v3 = vsel %vm1685_vm15, %v1684_v56, %v1592_v25 }
 0x375   : > { %v2027_v5 = vcombine.low %v1695_v62, %v1697_v3 }
 0x377   : > { %2094 = vmatmul.mubr.msk.bf16.gmra.mxu1 %vm1749_vm0, %v2027_v5 }
 0x416   : > { %v1797_v12 = vpop.f32.mrf.mxu1 }
 0x418   : > { %v2087_v24 = vpop.f32.mrf.mxu1 }
 0x41a   : > { %v1799_v39 = vpop.f32.mrf.mxu1 }
 0x41b   : > { %v1825_v8 = vmul.f32 %v2036_v17, %v1799_v39 }
 0x41c   : > { %v2088_v63 = vpop.f32.mrf.mxu1 }
 0x41d   : > { %v1836_v19 = vadd.f32 %v2037_v36, %v1825_v8 }
 0x41f   : > { %v1840_v15 = vmax.f32 %v1836_v19, 0.0 }
 0x421   : > { %1844 = vst.msk [vmem:[%s498_s27] sm:$0xff] %vm1080_vm6, %v1840_v15 }
 0x42b   : > { %v1804_v7 = vpop.f32.mrf.mxu1 }
 0x42c   : > { %v1826_v10 = vmul.f32 %v2036_v17, %v1804_v7 }
 0x42d   : > { %v2091_v9 = vpop.f32.mrf.mxu1 }
 0x42e   : > { %v1837_v13 = vadd.f32 %v2037_v36, %v1826_v10 }
 0x42f   : > { %v1807_v48 = vpop.f32.mrf.mxu1 }
 0x430   : > { %v1841_v21 = vmax.f32 %v1837_v13, 0.0  ;;  %v1827_v41 = vmul.f32 %v2036_v17, %v1807_v48 }
 0x431   : > { %v2092_v22 = vpop.f32.mrf.mxu1 }
 0x432   : > { %1845 = vst.msk [vmem:[%s498_s27 + $0x8] sm:$0xff] %vm1080_vm6, %v1841_v21  ;;  %v1838_v31 = vadd.f32 %v2037_v36, %v1827_v41 }
 0x434   : > { %v1842_v16 = vmax.f32 %v1838_v31, 0.0 }
 0x436   : > { %1846 = vst.msk [vmem:[%s498_s27 + $0x10] sm:$0xff] %vm1080_vm6, %v1842_v16 }
 0x437   : > { %v1812_v58 = vpop.f32.mrf.mxu1 }
 0x438   : > { %v1828_v59 = vmul.f32 %v2036_v17, %v1812_v58 }
 0x439   : > { %v2095_v43 = vpop.f32.mrf.mxu1 }
 0x43a   : > { %v1839_v46 = vadd.f32 %v2037_v36, %v1828_v59 }
 0x43b   : > { %v1815_v2 = vpop.f32.mrf.mxu1 }
 0x43c   : > { %v1843_v53 = vmax.f32 %v1839_v46, 0.0 }
 0x43d   : > { %v2096_v11 = vpop.f32.mrf.mxu1 }
 0x43e   : > { %1847 = vst.msk [vmem:[%s498_s27 + $0x18] sm:$0xff] %vm1080_vm6, %v1843_v53 }
 0x43f PF: > { %s19_s13 = sadd.s32 1, %s2201_s13   ;;  %s3094_s30 = smov %s2193_s11 }
 0x440   : > { %p16_p11 = scmp.ge.s32.totalorder %s19_s13, 6   ;;  %s3095_s10 = smov %s2197_s12 }
 0x441   : > { %s3096_s11 = smov %s3099_s14  ;;  %s3097_s12 = smov %s3103_s15 }
 0x442   :  { %18 = sbr.rel (!%p16_p11) target bundleno = 3 (0x3), region = 92 }

</bundles_post_ra>
